<compile_context>
chip_gen: v6e
topology: v6e:2x2x1
jax: 0.10.0
libtpu: 0.0.40
codegen_flags: <defaults>
</compile_context>

<pallas_src>
import math

import numpy as np

import jax
import jax.numpy as jnp
from jax.experimental import pallas as pl
from jax.experimental.pallas import tpu as pltpu


# ----------------------------------------------------------------------------- params

def default_params():
    return {
        'model/input/channels': 4,
        'model/conv1/filters': 16, 'model/conv1/kernel': 5,
        'model/conv2/filters': 16, 'model/conv2/kernel': 5,
        'model/conv3/filters': 16, 'model/conv3/kernel': 5,
        'model/maxpool1/kernel': 2,
        'model/maxpool2/kernel': 2,
        'model/maxpool3/kernel': 2,
        'model/fc1/features': 32,
        'model/fc2/features': 32,
        'model/fc3/features': 1,      # binary head (binary=True branch of Zrimec2020c)
    }


def _seq_dims(params, seq_len):
    """Per conv stage: (conv output length, pooled length)."""
    dims = []
    L = seq_len
    for i in (1, 2, 3):
        pool = params[f'model/maxpool{i}/kernel']
        Lo = L // pool
        dims.append((L, Lo))
        L = Lo
    return dims


# ----------------------------------------------------------------------------- weights

def init_weights(key, params, seq_len, v_features):
    """PyTorch-style U(-1/sqrt(fan_in), 1/sqrt(fan_in)) init, stored in kernel layout:
         conv w: (K, F, Cin)   conv b: (F, 1)
         fc1 conv-part: (F3, Lo3, H1) (PyTorch flatten order)   fc1 v-part: (Fv, H1)
         fc biases: (1, H)
    """
    ws = {}
    ks = jax.random.split(key, 12)

    def uni(k, shape, fan_in):
        bound = 1.0 / math.sqrt(float(fan_in))
        return jax.random.uniform(k, shape, jnp.float32, -bound, bound)

    c_in = params['model/input/channels']
    chain = [('conv1', c_in), ('conv2', params['model/conv1/filters']),
             ('conv3', params['model/conv2/filters'])]
    for i, (name, cin) in enumerate(chain):
        f = params[f'model/{name}/filters']
        k = params[f'model/{name}/kernel']
        fan = cin * k
        ws[f'{name}/w'] = uni(ks[2 * i], (k, f, cin), fan)      # (K, F, Cin)
        ws[f'{name}/b'] = uni(ks[2 * i + 1], (f, 1), fan)       # (F, 1)

    lo3 = _seq_dims(params, seq_len)[2][1]
    f3 = params['model/conv3/filters']
    flat = f3 * lo3
    d_in = flat + v_features
    h1 = params['model/fc1/features']
    h2 = params['model/fc2/features']
    h3 = params['model/fc3/features']

    w1 = uni(ks[6], (d_in, h1), d_in)
    ws['fc1/w_conv'] = w1[:flat].reshape(f3, lo3, h1)   # rows for flatten(conv features)
    ws['fc1/w_v'] = w1[flat:]                           # rows multiplying v
    ws['fc1/b'] = uni(ks[7], (1, h1), d_in)
    ws['fc2/w'] = uni(ks[8], (h1, h2), h1)
    ws['fc2/b'] = uni(ks[9], (1, h2), h1)
    ws['fc3/w'] = uni(ks[10], (h2, h3), h2)
    ws['fc3/b'] = uni(ks[11], (1, h3), h2)
    return ws


def pool_selectors(params, seq_len):
    """0/1 decimation matrices: max-pool = max over `pool` (F,L)@(L,Lo) matmuls."""
    sels = {}
    for i, (L, Lo) in enumerate(_seq_dims(params, seq_len), start=1):
        pool = params[f'model/maxpool{i}/kernel']
        l = np.arange(L)[:, None]
        lo = np.arange(Lo)[None, :]
        mats = np.stack([(l == pool * lo + p) for p in range(pool)]).astype(np.float32)
        sels[f'sel{i}'] = jnp.asarray(mats)                     # (pool, L, Lo)
    return sels


# ----------------------------------------------------------------------------- kernel

def zrimec2020c_forward(weights, sels, params, x, v):
    """x: (B, C, L) one-hot DNA (NCW), v: (B, Fv).  Returns (B, fc3) in (0, 1)."""
    B, C, L0 = x.shape
    Fv = v.shape[1]
    K = [params[f'model/conv{i}/kernel'] for i in (1, 2, 3)]
    F = [params[f'model/conv{i}/filters'] for i in (1, 2, 3)]
    P = [params[f'model/maxpool{i}/kernel'] for i in (1, 2, 3)]
    dims = _seq_dims(params, L0)                   # [(L1,Lo1),(L2,Lo2),(L3,Lo3)]
    H3 = params['model/fc3/features']
    pad = [(k - 1) // 2 for k in K]                # 'same' padding (odd K == PyTorch K//2)

    # Batch tile: whole batch for small B; otherwise 8-row tiles sharded over the grid.
    if B <= 8:
        TB = B
    else:
        assert B % 8 == 0, "for B > 8 this script expects B % 8 == 0"
        TB = 8
    grid = (B // TB,)

    def kernel(x_ref, v_ref,
               w1_ref, b1_ref, s1_ref,
               w2_ref, b2_ref, s2_ref,
               w3_ref, b3_ref, s3_ref,
               wf1c_ref, wf1v_ref, bf1_ref,
               wf2_ref, bf2_ref, wf3_ref, bf3_ref,
               o_ref,
               pad1_ref, pad2_ref, pad3_ref, feat_ref):
        # Zero the padded activation buffers ('same'-conv halo must be 0), then stage
        # the input block into the center of the first one.
        pad1_ref[...] = jnp.zeros(pad1_ref.shape, jnp.float32)
        pad2_ref[...] = jnp.zeros(pad2_ref.shape, jnp.float32)
        pad3_ref[...] = jnp.zeros(pad3_ref.shape, jnp.float32)
        pad1_ref[:, :, pad[0]:pad[0] + L0] = x_ref[...]

        def conv_relu_pool(src_ref, w_ref, b_ref, s_ref, dst_ref, dst_off,
                           L, Lo, kk, pool):
            """One fused stage: conv1d('same') + bias + ReLU + max-pool, per batch row.
            Activations are (F, L) with L lane-major; all dots are 2-D MXU matmuls."""
            w = w_ref[...]          # (K, F, Cin)
            bia = b_ref[...]        # (F, 1)
            sel = s_ref[...]        # (pool, L, Lo)
            for b in range(TB):
                acc = jnp.dot(w[0], src_ref[b, :, 0:L],
                              preferred_element_type=jnp.float32)           # (F, L)
                for k in range(1, kk):
                    acc = acc + jnp.dot(w[k], src_ref[b, :, k:k + L],
                                        preferred_element_type=jnp.float32)
                h = jnp.maximum(acc + bia, 0.0)                             # (F, L)
                pm = jnp.dot(h, sel[0], preferred_element_type=jnp.float32)  # (F, Lo)
                for p in range(1, pool):
                    pm = jnp.maximum(
                        pm, jnp.dot(h, sel[p], preferred_element_type=jnp.float32))
                dst_ref[b, :, dst_off:dst_off + Lo] = pm

        conv_relu_pool(pad1_ref, w1_ref, b1_ref, s1_ref, pad2_ref, pad[1],
                       dims[0][0], dims[0][1], K[0], P[0])
        conv_relu_pool(pad2_ref, w2_ref, b2_ref, s2_ref, pad3_ref, pad[2],
                       dims[1][0], dims[1][1], K[1], P[1])
        conv_relu_pool(pad3_ref, w3_ref, b3_ref, s3_ref, feat_ref, 0,
                       dims[2][0], dims[2][1], K[2], P[2])

        # Dense head, no concat: z @ W1 == v @ W1_v + sum_f feat[:, f, :] @ W1_conv[f]
        acc = jnp.dot(v_ref[...], wf1v_ref[...], preferred_element_type=jnp.float32)
        wf1c = wf1c_ref[...]                                   # (F3, Lo3, H1)
        for f in range(F[2]):
            acc = acc + jnp.dot(feat_ref[:, f, :], wf1c[f],
                                preferred_element_type=jnp.float32)
        h1 = jnp.maximum(acc + bf1_ref[...], 0.0)
        h2 = jnp.maximum(jnp.dot(h1, wf2_ref[...],
                                 preferred_element_type=jnp.float32) + bf2_ref[...], 0.0)
        logits = jnp.dot(h2, wf3_ref[...],
                         preferred_element_type=jnp.float32) + bf3_ref[...]
        o_ref[...] = jax.nn.sigmoid(logits)

    def full_spec(a):
        nd = a.ndim
        return pl.BlockSpec(a.shape, lambda i, _nd=nd: (0,) * _nd)

    weight_args = [weights['conv1/w'], weights['conv1/b'], sels['sel1'],
                   weights['conv2/w'], weights['conv2/b'], sels['sel2'],
                   weights['conv3/w'], weights['conv3/b'], sels['sel3'],
                   weights['fc1/w_conv'], weights['fc1/w_v'], weights['fc1/b'],
                   weights['fc2/w'], weights['fc2/b'],
                   weights['fc3/w'], weights['fc3/b']]

    in_specs = [pl.BlockSpec((TB, C, L0), lambda i: (i, 0, 0)),
                pl.BlockSpec((TB, Fv), lambda i: (i, 0))]
    in_specs += [full_spec(a) for a in weight_args]

    scratch_shapes = [
        pltpu.VMEM((TB, C, L0 + K[0] - 1), jnp.float32),            # padded input
        pltpu.VMEM((TB, F[0], dims[1][0] + K[1] - 1), jnp.float32),  # padded pool1 out
        pltpu.VMEM((TB, F[1], dims[2][0] + K[2] - 1), jnp.float32),  # padded pool2 out
        pltpu.VMEM((TB, F[2], dims[2][1]), jnp.float32),             # pool3 out (features)
    ]

    return pl.pallas_call(
        kernel,
        out_shape=jax.ShapeDtypeStruct((B, H3), jnp.float32),
        grid=grid,
        in_specs=in_specs,
        out_specs=pl.BlockSpec((TB, H3), lambda i: (i, 0)),
        scratch_shapes=scratch_shapes,
        compiler_params=pltpu.CompilerParams(
            dimension_semantics=("parallel",)),   # shards batch tiles across v7x's 2 TCs
    )(x, v, *weight_args)


# ----------------------------------------------------------------------------- reference

def reference_forward(weights, params, x, v):
    """Pure-JAX (XLA) reference with identical semantics, for a numerical self-check."""
    B = x.shape[0]
    h = x
    for i in (1, 2, 3):
        w = weights[f'conv{i}/w']           # (K, F, Cin)
        b = weights[f'conv{i}/b']           # (F, 1)
        kk = w.shape[0]
        pl_ = (kk - 1) // 2
        pr = kk - 1 - pl_
        Lc = h.shape[2]
        hp = jnp.pad(h, ((0, 0), (0, 0), (pl_, pr)))
        out = jnp.zeros((B, w.shape[1], Lc), jnp.float32)
        for k in range(kk):
            out = out + jnp.einsum('fc,bcl->bfl', w[k], hp[:, :, k:k + Lc])
        out = jnp.maximum(out + b[None, :, :], 0.0)
        pool = params[f'model/maxpool{i}/kernel']
        Lo = Lc // pool
        h = out[:, :, :Lo * pool].reshape(B, w.shape[1], Lo, pool).max(axis=-1)
    acc = v @ weights['fc1/w_v'] + jnp.einsum('bfl,flh->bh', h, weights['fc1/w_conv'])
    h1 = jnp.maximum(acc + weights['fc1/b'], 0.0)
    h2 = jnp.maximum(h1 @ weights['fc2/w'] + weights['fc2/b'], 0.0)
    return jax.nn.sigmoid(h2 @ weights['fc3/w'] + weights['fc3/b'])


# ----------------------------------------------------------------------------- main

if __name__ == "__main__":
    key = jax.random.PRNGKey(0)
    k_x, k_v, k_w = jax.random.split(key, 3)

    B, C, L, Fv = 2, 4, 32, 8
    params = default_params()

    # deterministic small inputs: one-hot DNA tensor (NCW) + conditioning features
    idx = jax.random.randint(k_x, (B, L), 0, C)
    x = jnp.transpose(jax.nn.one_hot(idx, C, dtype=jnp.float32), (0, 2, 1))  # (B, C, L)
    v = jax.random.normal(k_v, (B, Fv), dtype=jnp.float32)

    weights = init_weights(k_w, params, seq_len=L, v_features=Fv)
    sels = pool_selectors(params, seq_len=L)

    out = zrimec2020c_forward(weights, sels, params, x, v)
    out = jax.block_until_ready(out)
    assert out.shape == (B, params['model/fc3/features'])

    ref = reference_forward(weights, params, x, v)
    assert jnp.allclose(out, ref, atol=5e-3, rtol=5e-3), (out, ref)
    assert bool(jnp.all((out > 0.0) & (out < 1.0)))
    print("KERNEL_OK")
</pallas_src>

<mosaic_0001>
module attributes {stable_mosaic.version = 11 : i64} {
  func.func @kernel(%arg0: i32, %arg1: memref<2x4x32xf32, #tpu.memory_space<vmem>>, %arg2: memref<2x8xf32, #tpu.memory_space<vmem>>, %arg3: memref<5x16x4xf32, #tpu.memory_space<vmem>>, %arg4: memref<16x1xf32, #tpu.memory_space<vmem>>, %arg5: memref<2x32x16xf32, #tpu.memory_space<vmem>>, %arg6: memref<5x16x16xf32, #tpu.memory_space<vmem>>, %arg7: memref<16x1xf32, #tpu.memory_space<vmem>>, %arg8: memref<2x16x8xf32, #tpu.memory_space<vmem>>, %arg9: memref<5x16x16xf32, #tpu.memory_space<vmem>>, %arg10: memref<16x1xf32, #tpu.memory_space<vmem>>, %arg11: memref<2x8x4xf32, #tpu.memory_space<vmem>>, %arg12: memref<16x4x32xf32, #tpu.memory_space<vmem>>, %arg13: memref<8x32xf32, #tpu.memory_space<vmem>>, %arg14: memref<1x32xf32, #tpu.memory_space<vmem>>, %arg15: memref<32x32xf32, #tpu.memory_space<vmem>>, %arg16: memref<1x32xf32, #tpu.memory_space<vmem>>, %arg17: memref<32x1xf32, #tpu.memory_space<vmem>>, %arg18: memref<1x1xf32, #tpu.memory_space<vmem>>, %arg19: memref<2x1xf32, #tpu.memory_space<vmem>>, %arg20: memref<2x4x36xf32, #tpu.memory_space<vmem>>, %arg21: memref<2x16x20xf32, #tpu.memory_space<vmem>>, %arg22: memref<2x16x12xf32, #tpu.memory_space<vmem>>, %arg23: memref<2x16x4xf32, #tpu.memory_space<vmem>>) attributes {dimension_semantics = [#tpu.dimension_semantics<parallel>], iteration_bounds = array<i64: 1>, scalar_prefetch = 0 : i64, scratch_operands = 4 : i64, tpu.core_type = #tpu.core_type<tc>, window_params = [{transform_indices = @transform_0, window_bounds = array<i64: 2, 4, 32>}, {transform_indices = @transform_1, window_bounds = array<i64: 2, 8>}, {pipeline_mode = #tpu.pipeline_mode<synchronous>, transform_indices = @transform_2, window_bounds = array<i64: 5, 16, 4>}, {pipeline_mode = #tpu.pipeline_mode<synchronous>, transform_indices = @transform_3, window_bounds = array<i64: 16, 1>}, {pipeline_mode = #tpu.pipeline_mode<synchronous>, transform_indices = @transform_4, window_bounds = array<i64: 2, 32, 16>}, {pipeline_mode = #tpu.pipeline_mode<synchronous>, transform_indices = @transform_5, window_bounds = array<i64: 5, 16, 16>}, {pipeline_mode = #tpu.pipeline_mode<synchronous>, transform_indices = @transform_6, window_bounds = array<i64: 16, 1>}, {pipeline_mode = #tpu.pipeline_mode<synchronous>, transform_indices = @transform_7, window_bounds = array<i64: 2, 16, 8>}, {pipeline_mode = #tpu.pipeline_mode<synchronous>, transform_indices = @transform_8, window_bounds = array<i64: 5, 16, 16>}, {pipeline_mode = #tpu.pipeline_mode<synchronous>, transform_indices = @transform_9, window_bounds = array<i64: 16, 1>}, {pipeline_mode = #tpu.pipeline_mode<synchronous>, transform_indices = @transform_10, window_bounds = array<i64: 2, 8, 4>}, {pipeline_mode = #tpu.pipeline_mode<synchronous>, transform_indices = @transform_11, window_bounds = array<i64: 16, 4, 32>}, {pipeline_mode = #tpu.pipeline_mode<synchronous>, transform_indices = @transform_12, window_bounds = array<i64: 8, 32>}, {pipeline_mode = #tpu.pipeline_mode<synchronous>, transform_indices = @transform_13, window_bounds = array<i64: 1, 32>}, {pipeline_mode = #tpu.pipeline_mode<synchronous>, transform_indices = @transform_14, window_bounds = array<i64: 32, 32>}, {pipeline_mode = #tpu.pipeline_mode<synchronous>, transform_indices = @transform_15, window_bounds = array<i64: 1, 32>}, {pipeline_mode = #tpu.pipeline_mode<synchronous>, transform_indices = @transform_16, window_bounds = array<i64: 32, 1>}, {pipeline_mode = #tpu.pipeline_mode<synchronous>, transform_indices = @transform_17, window_bounds = array<i64: 1, 1>}, {transform_indices = @transform_18, window_bounds = array<i64: 2, 1>}]} {
    %cst = arith.constant 0.000000e+00 : f32
    %0 = vector.broadcast %cst : f32 to vector<2x4x36xf32>
    %c0 = arith.constant 0 : index
    %c0_0 = arith.constant 0 : index
    %c0_1 = arith.constant 0 : index
    %1 = vector.load %arg20[%c0, %c0_0, %c0_1] : memref<2x4x36xf32, #tpu.memory_space<vmem>>, vector<2x4x36xf32>
    tpu.vector_store %arg20[%c0, %c0_0, %c0_1], %0 {strides = array<i32>} : memref<2x4x36xf32, #tpu.memory_space<vmem>>, vector<2x4x36xf32>,
    %cst_2 = arith.constant 0.000000e+00 : f32
    %2 = vector.broadcast %cst_2 : f32 to vector<2x16x20xf32>
    %c0_3 = arith.constant 0 : index
    %c0_4 = arith.constant 0 : index
    %c0_5 = arith.constant 0 : index
    %3 = vector.load %arg21[%c0_3, %c0_4, %c0_5] : memref<2x16x20xf32, #tpu.memory_space<vmem>>, vector<2x16x20xf32>
    tpu.vector_store %arg21[%c0_3, %c0_4, %c0_5], %2 {strides = array<i32>} : memref<2x16x20xf32, #tpu.memory_space<vmem>>, vector<2x16x20xf32>,
    %cst_6 = arith.constant 0.000000e+00 : f32
    %4 = vector.broadcast %cst_6 : f32 to vector<2x16x12xf32>
    %c0_7 = arith.constant 0 : index
    %c0_8 = arith.constant 0 : index
    %c0_9 = arith.constant 0 : index
    %5 = vector.load %arg22[%c0_7, %c0_8, %c0_9] : memref<2x16x12xf32, #tpu.memory_space<vmem>>, vector<2x16x12xf32>
    tpu.vector_store %arg22[%c0_7, %c0_8, %c0_9], %4 {strides = array<i32>} : memref<2x16x12xf32, #tpu.memory_space<vmem>>, vector<2x16x12xf32>,
    %c0_10 = arith.constant 0 : index
    %c0_11 = arith.constant 0 : index
    %c0_12 = arith.constant 0 : index
    %6 = vector.load %arg1[%c0_10, %c0_11, %c0_12] : memref<2x4x32xf32, #tpu.memory_space<vmem>>, vector<2x4x32xf32>
    %c0_13 = arith.constant 0 : index
    %c0_14 = arith.constant 0 : index
    %c2 = arith.constant 2 : index
    %7 = vector.load %arg20[%c0_13, %c0_14, %c2] : memref<2x4x36xf32, #tpu.memory_space<vmem>>, vector<2x4x32xf32>
    tpu.vector_store %arg20[%c0_13, %c0_14, %c2], %6 {strides = array<i32>} : memref<2x4x36xf32, #tpu.memory_space<vmem>>, vector<2x4x32xf32>,
    %c0_15 = arith.constant 0 : index
    %c0_16 = arith.constant 0 : index
    %c0_17 = arith.constant 0 : index
    %8 = vector.load %arg3[%c0_15, %c0_16, %c0_17] : memref<5x16x4xf32, #tpu.memory_space<vmem>>, vector<5x16x4xf32>
    %c0_18 = arith.constant 0 : index
    %c0_19 = arith.constant 0 : index
    %9 = vector.load %arg4[%c0_18, %c0_19] : memref<16x1xf32, #tpu.memory_space<vmem>>, vector<16x1xf32>
    %c0_20 = arith.constant 0 : index
    %c0_21 = arith.constant 0 : index
    %c0_22 = arith.constant 0 : index
    %10 = vector.load %arg5[%c0_20, %c0_21, %c0_22] : memref<2x32x16xf32, #tpu.memory_space<vmem>>, vector<2x32x16xf32>
    %11 = vector.extract_strided_slice %8 {offsets = [0, 0, 0], sizes = [1, 16, 4], strides = [1, 1, 1]} : vector<5x16x4xf32> to vector<1x16x4xf32>
    %12 = vector.shape_cast %11 : vector<1x16x4xf32> to vector<16x4xf32>
    %c0_23 = arith.constant 0 : index
    %c0_24 = arith.constant 0 : index
    %c0_25 = arith.constant 0 : index
    %13 = vector.load %arg20[%c0_23, %c0_24, %c0_25] : memref<2x4x36xf32, #tpu.memory_space<vmem>>, vector<1x4x32xf32>
    %14 = vector.shape_cast %13 : vector<1x4x32xf32> to vector<4x32xf32>
    %cst_26 = arith.constant dense<0.000000e+00> : vector<16x32xf32>
    %15 = tpu.matmul %12, %14, %cst_26 {dimension_numbers = #tpu.dot_dimension_numbers<[1], [0], [0], [1], [0, 0, 1, 1], [], []>} : vector<16x4xf32>, vector<4x32xf32>, vector<16x32xf32> -> vector<16x32xf32>
    %16 = vector.extract_strided_slice %8 {offsets = [1, 0, 0], sizes = [1, 16, 4], strides = [1, 1, 1]} : vector<5x16x4xf32> to vector<1x16x4xf32>
    %17 = vector.shape_cast %16 : vector<1x16x4xf32> to vector<16x4xf32>
    %c0_27 = arith.constant 0 : index
    %c0_28 = arith.constant 0 : index
    %c1 = arith.constant 1 : index
    %18 = vector.load %arg20[%c0_27, %c0_28, %c1] : memref<2x4x36xf32, #tpu.memory_space<vmem>>, vector<1x4x32xf32>
    %19 = vector.shape_cast %18 : vector<1x4x32xf32> to vector<4x32xf32>
    %cst_29 = arith.constant dense<0.000000e+00> : vector<16x32xf32>
    %20 = tpu.matmul %17, %19, %cst_29 {dimension_numbers = #tpu.dot_dimension_numbers<[1], [0], [0], [1], [0, 0, 1, 1], [], []>} : vector<16x4xf32>, vector<4x32xf32>, vector<16x32xf32> -> vector<16x32xf32>
    %21 = arith.addf %15, %20 : vector<16x32xf32>
    %22 = vector.extract_strided_slice %8 {offsets = [2, 0, 0], sizes = [1, 16, 4], strides = [1, 1, 1]} : vector<5x16x4xf32> to vector<1x16x4xf32>
    %23 = vector.shape_cast %22 : vector<1x16x4xf32> to vector<16x4xf32>
    %c0_30 = arith.constant 0 : index
    %c0_31 = arith.constant 0 : index
    %c2_32 = arith.constant 2 : index
    %24 = vector.load %arg20[%c0_30, %c0_31, %c2_32] : memref<2x4x36xf32, #tpu.memory_space<vmem>>, vector<1x4x32xf32>
    %25 = vector.shape_cast %24 : vector<1x4x32xf32> to vector<4x32xf32>
    %cst_33 = arith.constant dense<0.000000e+00> : vector<16x32xf32>
    %26 = tpu.matmul %23, %25, %cst_33 {dimension_numbers = #tpu.dot_dimension_numbers<[1], [0], [0], [1], [0, 0, 1, 1], [], []>} : vector<16x4xf32>, vector<4x32xf32>, vector<16x32xf32> -> vector<16x32xf32>
    %27 = arith.addf %21, %26 : vector<16x32xf32>
    %28 = vector.extract_strided_slice %8 {offsets = [3, 0, 0], sizes = [1, 16, 4], strides = [1, 1, 1]} : vector<5x16x4xf32> to vector<1x16x4xf32>
    %29 = vector.shape_cast %28 : vector<1x16x4xf32> to vector<16x4xf32>
    %c0_34 = arith.constant 0 : index
    %c0_35 = arith.constant 0 : index
    %c3 = arith.constant 3 : index
    %30 = vector.load %arg20[%c0_34, %c0_35, %c3] : memref<2x4x36xf32, #tpu.memory_space<vmem>>, vector<1x4x32xf32>
    %31 = vector.shape_cast %30 : vector<1x4x32xf32> to vector<4x32xf32>
    %cst_36 = arith.constant dense<0.000000e+00> : vector<16x32xf32>
    %32 = tpu.matmul %29, %31, %cst_36 {dimension_numbers = #tpu.dot_dimension_numbers<[1], [0], [0], [1], [0, 0, 1, 1], [], []>} : vector<16x4xf32>, vector<4x32xf32>, vector<16x32xf32> -> vector<16x32xf32>
    %33 = arith.addf %27, %32 : vector<16x32xf32>
    %34 = vector.extract_strided_slice %8 {offsets = [4, 0, 0], sizes = [1, 16, 4], strides = [1, 1, 1]} : vector<5x16x4xf32> to vector<1x16x4xf32>
    %35 = vector.shape_cast %34 : vector<1x16x4xf32> to vector<16x4xf32>
    %c0_37 = arith.constant 0 : index
    %c0_38 = arith.constant 0 : index
    %c4 = arith.constant 4 : index
    %36 = vector.load %arg20[%c0_37, %c0_38, %c4] : memref<2x4x36xf32, #tpu.memory_space<vmem>>, vector<1x4x32xf32>
    %37 = vector.shape_cast %36 : vector<1x4x32xf32> to vector<4x32xf32>
    %cst_39 = arith.constant dense<0.000000e+00> : vector<16x32xf32>
    %38 = tpu.matmul %35, %37, %cst_39 {dimension_numbers = #tpu.dot_dimension_numbers<[1], [0], [0], [1], [0, 0, 1, 1], [], []>} : vector<16x4xf32>, vector<4x32xf32>, vector<16x32xf32> -> vector<16x32xf32>
    %39 = arith.addf %33, %38 : vector<16x32xf32>
    %40 = vector.broadcast %9 : vector<16x1xf32> to vector<16x32xf32>
    %41 = arith.addf %39, %40 : vector<16x32xf32>
    %cst_40 = arith.constant 0.000000e+00 : f32
    %42 = vector.broadcast %cst_40 : f32 to vector<16x32xf32>
    %43 = arith.maximumf %41, %42 : vector<16x32xf32>
    %44 = vector.extract_strided_slice %10 {offsets = [0, 0, 0], sizes = [1, 32, 16], strides = [1, 1, 1]} : vector<2x32x16xf32> to vector<1x32x16xf32>
    %45 = vector.shape_cast %44 : vector<1x32x16xf32> to vector<32x16xf32>
    %cst_41 = arith.constant dense<0.000000e+00> : vector<16x16xf32>
    %46 = tpu.matmul %43, %45, %cst_41 {dimension_numbers = #tpu.dot_dimension_numbers<[1], [0], [0], [1], [0, 0, 1, 1], [], []>} : vector<16x32xf32>, vector<32x16xf32>, vector<16x16xf32> -> vector<16x16xf32>
    %47 = vector.extract_strided_slice %10 {offsets = [1, 0, 0], sizes = [1, 32, 16], strides = [1, 1, 1]} : vector<2x32x16xf32> to vector<1x32x16xf32>
    %48 = vector.shape_cast %47 : vector<1x32x16xf32> to vector<32x16xf32>
    %cst_42 = arith.constant dense<0.000000e+00> : vector<16x16xf32>
    %49 = tpu.matmul %43, %48, %cst_42 {dimension_numbers = #tpu.dot_dimension_numbers<[1], [0], [0], [1], [0, 0, 1, 1], [], []>} : vector<16x32xf32>, vector<32x16xf32>, vector<16x16xf32> -> vector<16x16xf32>
    %50 = arith.maximumf %46, %49 : vector<16x16xf32>
    %c0_43 = arith.constant 0 : index
    %c0_44 = arith.constant 0 : index
    %c2_45 = arith.constant 2 : index
    %51 = vector.load %arg21[%c0_43, %c0_44, %c2_45] : memref<2x16x20xf32, #tpu.memory_space<vmem>>, vector<1x16x16xf32>
    %52 = vector.shape_cast %51 : vector<1x16x16xf32> to vector<16x16xf32>
    %53 = vector.shape_cast %50 : vector<16x16xf32> to vector<1x16x16xf32>
    tpu.vector_store %arg21[%c0_43, %c0_44, %c2_45], %53 {strides = array<i32>} : memref<2x16x20xf32, #tpu.memory_space<vmem>>, vector<1x16x16xf32>,
    %54 = vector.extract_strided_slice %8 {offsets = [0, 0, 0], sizes = [1, 16, 4], strides = [1, 1, 1]} : vector<5x16x4xf32> to vector<1x16x4xf32>
    %55 = vector.shape_cast %54 : vector<1x16x4xf32> to vector<16x4xf32>
    %c1_46 = arith.constant 1 : index
    %c0_47 = arith.constant 0 : index
    %c0_48 = arith.constant 0 : index
    %56 = vector.load %arg20[%c1_46, %c0_47, %c0_48] : memref<2x4x36xf32, #tpu.memory_space<vmem>>, vector<1x4x32xf32>
    %57 = vector.shape_cast %56 : vector<1x4x32xf32> to vector<4x32xf32>
    %cst_49 = arith.constant dense<0.000000e+00> : vector<16x32xf32>
    %58 = tpu.matmul %55, %57, %cst_49 {dimension_numbers = #tpu.dot_dimension_numbers<[1], [0], [0], [1], [0, 0, 1, 1], [], []>} : vector<16x4xf32>, vector<4x32xf32>, vector<16x32xf32> -> vector<16x32xf32>
    %59 = vector.extract_strided_slice %8 {offsets = [1, 0, 0], sizes = [1, 16, 4], strides = [1, 1, 1]} : vector<5x16x4xf32> to vector<1x16x4xf32>
    %60 = vector.shape_cast %59 : vector<1x16x4xf32> to vector<16x4xf32>
    %c1_50 = arith.constant 1 : index
    %c0_51 = arith.constant 0 : index
    %c1_52 = arith.constant 1 : index
    %61 = vector.load %arg20[%c1_50, %c0_51, %c1_52] : memref<2x4x36xf32, #tpu.memory_space<vmem>>, vector<1x4x32xf32>
    %62 = vector.shape_cast %61 : vector<1x4x32xf32> to vector<4x32xf32>
    %cst_53 = arith.constant dense<0.000000e+00> : vector<16x32xf32>
    %63 = tpu.matmul %60, %62, %cst_53 {dimension_numbers = #tpu.dot_dimension_numbers<[1], [0], [0], [1], [0, 0, 1, 1], [], []>} : vector<16x4xf32>, vector<4x32xf32>, vector<16x32xf32> -> vector<16x32xf32>
    %64 = arith.addf %58, %63 : vector<16x32xf32>
    %65 = vector.extract_strided_slice %8 {offsets = [2, 0, 0], sizes = [1, 16, 4], strides = [1, 1, 1]} : vector<5x16x4xf32> to vector<1x16x4xf32>
    %66 = vector.shape_cast %65 : vector<1x16x4xf32> to vector<16x4xf32>
    %c1_54 = arith.constant 1 : index
    %c0_55 = arith.constant 0 : index
    %c2_56 = arith.constant 2 : index
    %67 = vector.load %arg20[%c1_54, %c0_55, %c2_56] : memref<2x4x36xf32, #tpu.memory_space<vmem>>, vector<1x4x32xf32>
    %68 = vector.shape_cast %67 : vector<1x4x32xf32> to vector<4x32xf32>
    %cst_57 = arith.constant dense<0.000000e+00> : vector<16x32xf32>
    %69 = tpu.matmul %66, %68, %cst_57 {dimension_numbers = #tpu.dot_dimension_numbers<[1], [0], [0], [1], [0, 0, 1, 1], [], []>} : vector<16x4xf32>, vector<4x32xf32>, vector<16x32xf32> -> vector<16x32xf32>
    %70 = arith.addf %64, %69 : vector<16x32xf32>
    %71 = vector.extract_strided_slice %8 {offsets = [3, 0, 0], sizes = [1, 16, 4], strides = [1, 1, 1]} : vector<5x16x4xf32> to vector<1x16x4xf32>
    %72 = vector.shape_cast %71 : vector<1x16x4xf32> to vector<16x4xf32>
    %c1_58 = arith.constant 1 : index
    %c0_59 = arith.constant 0 : index
    %c3_60 = arith.constant 3 : index
    %73 = vector.load %arg20[%c1_58, %c0_59, %c3_60] : memref<2x4x36xf32, #tpu.memory_space<vmem>>, vector<1x4x32xf32>
    %74 = vector.shape_cast %73 : vector<1x4x32xf32> to vector<4x32xf32>
    %cst_61 = arith.constant dense<0.000000e+00> : vector<16x32xf32>
    %75 = tpu.matmul %72, %74, %cst_61 {dimension_numbers = #tpu.dot_dimension_numbers<[1], [0], [0], [1], [0, 0, 1, 1], [], []>} : vector<16x4xf32>, vector<4x32xf32>, vector<16x32xf32> -> vector<16x32xf32>
    %76 = arith.addf %70, %75 : vector<16x32xf32>
    %77 = vector.extract_strided_slice %8 {offsets = [4, 0, 0], sizes = [1, 16, 4], strides = [1, 1, 1]} : vector<5x16x4xf32> to vector<1x16x4xf32>
    %78 = vector.shape_cast %77 : vector<1x16x4xf32> to vector<16x4xf32>
    %c1_62 = arith.constant 1 : index
    %c0_63 = arith.constant 0 : index
    %c4_64 = arith.constant 4 : index
    %79 = vector.load %arg20[%c1_62, %c0_63, %c4_64] : memref<2x4x36xf32, #tpu.memory_space<vmem>>, vector<1x4x32xf32>
    %80 = vector.shape_cast %79 : vector<1x4x32xf32> to vector<4x32xf32>
    %cst_65 = arith.constant dense<0.000000e+00> : vector<16x32xf32>
    %81 = tpu.matmul %78, %80, %cst_65 {dimension_numbers = #tpu.dot_dimension_numbers<[1], [0], [0], [1], [0, 0, 1, 1], [], []>} : vector<16x4xf32>, vector<4x32xf32>, vector<16x32xf32> -> vector<16x32xf32>
    %82 = arith.addf %76, %81 : vector<16x32xf32>
    %83 = vector.broadcast %9 : vector<16x1xf32> to vector<16x32xf32>
    %84 = arith.addf %82, %83 : vector<16x32xf32>
    %cst_66 = arith.constant 0.000000e+00 : f32
    %85 = vector.broadcast %cst_66 : f32 to vector<16x32xf32>
    %86 = arith.maximumf %84, %85 : vector<16x32xf32>
    %87 = vector.extract_strided_slice %10 {offsets = [0, 0, 0], sizes = [1, 32, 16], strides = [1, 1, 1]} : vector<2x32x16xf32> to vector<1x32x16xf32>
    %88 = vector.shape_cast %87 : vector<1x32x16xf32> to vector<32x16xf32>
    %cst_67 = arith.constant dense<0.000000e+00> : vector<16x16xf32>
    %89 = tpu.matmul %86, %88, %cst_67 {dimension_numbers = #tpu.dot_dimension_numbers<[1], [0], [0], [1], [0, 0, 1, 1], [], []>} : vector<16x32xf32>, vector<32x16xf32>, vector<16x16xf32> -> vector<16x16xf32>
    %90 = vector.extract_strided_slice %10 {offsets = [1, 0, 0], sizes = [1, 32, 16], strides = [1, 1, 1]} : vector<2x32x16xf32> to vector<1x32x16xf32>
    %91 = vector.shape_cast %90 : vector<1x32x16xf32> to vector<32x16xf32>
    %cst_68 = arith.constant dense<0.000000e+00> : vector<16x16xf32>
    %92 = tpu.matmul %86, %91, %cst_68 {dimension_numbers = #tpu.dot_dimension_numbers<[1], [0], [0], [1], [0, 0, 1, 1], [], []>} : vector<16x32xf32>, vector<32x16xf32>, vector<16x16xf32> -> vector<16x16xf32>
    %93 = arith.maximumf %89, %92 : vector<16x16xf32>
    %c1_69 = arith.constant 1 : index
    %c0_70 = arith.constant 0 : index
    %c2_71 = arith.constant 2 : index
    %94 = vector.load %arg21[%c1_69, %c0_70, %c2_71] : memref<2x16x20xf32, #tpu.memory_space<vmem>>, vector<1x16x16xf32>
    %95 = vector.shape_cast %94 : vector<1x16x16xf32> to vector<16x16xf32>
    %96 = vector.shape_cast %93 : vector<16x16xf32> to vector<1x16x16xf32>
    tpu.vector_store %arg21[%c1_69, %c0_70, %c2_71], %96 {strides = array<i32>} : memref<2x16x20xf32, #tpu.memory_space<vmem>>, vector<1x16x16xf32>,
    %c0_72 = arith.constant 0 : index
    %c0_73 = arith.constant 0 : index
    %c0_74 = arith.constant 0 : index
    %97 = vector.load %arg6[%c0_72, %c0_73, %c0_74] : memref<5x16x16xf32, #tpu.memory_space<vmem>>, vector<5x16x16xf32>
    %c0_75 = arith.constant 0 : index
    %c0_76 = arith.constant 0 : index
    %98 = vector.load %arg7[%c0_75, %c0_76] : memref<16x1xf32, #tpu.memory_space<vmem>>, vector<16x1xf32>
    %c0_77 = arith.constant 0 : index
    %c0_78 = arith.constant 0 : index
    %c0_79 = arith.constant 0 : index
    %99 = vector.load %arg8[%c0_77, %c0_78, %c0_79] : memref<2x16x8xf32, #tpu.memory_space<vmem>>, vector<2x16x8xf32>
    %100 = vector.extract_strided_slice %97 {offsets = [0, 0, 0], sizes = [1, 16, 16], strides = [1, 1, 1]} : vector<5x16x16xf32> to vector<1x16x16xf32>
    %101 = vector.shape_cast %100 : vector<1x16x16xf32> to vector<16x16xf32>
    %c0_80 = arith.constant 0 : index
    %c0_81 = arith.constant 0 : index
    %c0_82 = arith.constant 0 : index
    %102 = vector.load %arg21[%c0_80, %c0_81, %c0_82] : memref<2x16x20xf32, #tpu.memory_space<vmem>>, vector<1x16x16xf32>
    %103 = vector.shape_cast %102 : vector<1x16x16xf32> to vector<16x16xf32>
    %cst_83 = arith.constant dense<0.000000e+00> : vector<16x16xf32>
    %104 = tpu.matmul %101, %103, %cst_83 {dimension_numbers = #tpu.dot_dimension_numbers<[1], [0], [0], [1], [0, 0, 1, 1], [], []>} : vector<16x16xf32>, vector<16x16xf32>, vector<16x16xf32> -> vector<16x16xf32>
    %105 = vector.extract_strided_slice %97 {offsets = [1, 0, 0], sizes = [1, 16, 16], strides = [1, 1, 1]} : vector<5x16x16xf32> to vector<1x16x16xf32>
    %106 = vector.shape_cast %105 : vector<1x16x16xf32> to vector<16x16xf32>
    %c0_84 = arith.constant 0 : index
    %c0_85 = arith.constant 0 : index
    %c1_86 = arith.constant 1 : index
    %107 = vector.load %arg21[%c0_84, %c0_85, %c1_86] : memref<2x16x20xf32, #tpu.memory_space<vmem>>, vector<1x16x16xf32>
    %108 = vector.shape_cast %107 : vector<1x16x16xf32> to vector<16x16xf32>
    %cst_87 = arith.constant dense<0.000000e+00> : vector<16x16xf32>
    %109 = tpu.matmul %106, %108, %cst_87 {dimension_numbers = #tpu.dot_dimension_numbers<[1], [0], [0], [1], [0, 0, 1, 1], [], []>} : vector<16x16xf32>, vector<16x16xf32>, vector<16x16xf32> -> vector<16x16xf32>
    %110 = arith.addf %104, %109 : vector<16x16xf32>
    %111 = vector.extract_strided_slice %97 {offsets = [2, 0, 0], sizes = [1, 16, 16], strides = [1, 1, 1]} : vector<5x16x16xf32> to vector<1x16x16xf32>
    %112 = vector.shape_cast %111 : vector<1x16x16xf32> to vector<16x16xf32>
    %c0_88 = arith.constant 0 : index
    %c0_89 = arith.constant 0 : index
    %c2_90 = arith.constant 2 : index
    %113 = vector.load %arg21[%c0_88, %c0_89, %c2_90] : memref<2x16x20xf32, #tpu.memory_space<vmem>>, vector<1x16x16xf32>
    %114 = vector.shape_cast %113 : vector<1x16x16xf32> to vector<16x16xf32>
    %cst_91 = arith.constant dense<0.000000e+00> : vector<16x16xf32>
    %115 = tpu.matmul %112, %114, %cst_91 {dimension_numbers = #tpu.dot_dimension_numbers<[1], [0], [0], [1], [0, 0, 1, 1], [], []>} : vector<16x16xf32>, vector<16x16xf32>, vector<16x16xf32> -> vector<16x16xf32>
    %116 = arith.addf %110, %115 : vector<16x16xf32>
    %117 = vector.extract_strided_slice %97 {offsets = [3, 0, 0], sizes = [1, 16, 16], strides = [1, 1, 1]} : vector<5x16x16xf32> to vector<1x16x16xf32>
    %118 = vector.shape_cast %117 : vector<1x16x16xf32> to vector<16x16xf32>
    %c0_92 = arith.constant 0 : index
    %c0_93 = arith.constant 0 : index
    %c3_94 = arith.constant 3 : index
    %119 = vector.load %arg21[%c0_92, %c0_93, %c3_94] : memref<2x16x20xf32, #tpu.memory_space<vmem>>, vector<1x16x16xf32>
    %120 = vector.shape_cast %119 : vector<1x16x16xf32> to vector<16x16xf32>
    %cst_95 = arith.constant dense<0.000000e+00> : vector<16x16xf32>
    %121 = tpu.matmul %118, %120, %cst_95 {dimension_numbers = #tpu.dot_dimension_numbers<[1], [0], [0], [1], [0, 0, 1, 1], [], []>} : vector<16x16xf32>, vector<16x16xf32>, vector<16x16xf32> -> vector<16x16xf32>
    %122 = arith.addf %116, %121 : vector<16x16xf32>
    %123 = vector.extract_strided_slice %97 {offsets = [4, 0, 0], sizes = [1, 16, 16], strides = [1, 1, 1]} : vector<5x16x16xf32> to vector<1x16x16xf32>
    %124 = vector.shape_cast %123 : vector<1x16x16xf32> to vector<16x16xf32>
    %c0_96 = arith.constant 0 : index
    %c0_97 = arith.constant 0 : index
    %c4_98 = arith.constant 4 : index
    %125 = vector.load %arg21[%c0_96, %c0_97, %c4_98] : memref<2x16x20xf32, #tpu.memory_space<vmem>>, vector<1x16x16xf32>
    %126 = vector.shape_cast %125 : vector<1x16x16xf32> to vector<16x16xf32>
    %cst_99 = arith.constant dense<0.000000e+00> : vector<16x16xf32>
    %127 = tpu.matmul %124, %126, %cst_99 {dimension_numbers = #tpu.dot_dimension_numbers<[1], [0], [0], [1], [0, 0, 1, 1], [], []>} : vector<16x16xf32>, vector<16x16xf32>, vector<16x16xf32> -> vector<16x16xf32>
    %128 = arith.addf %122, %127 : vector<16x16xf32>
    %129 = vector.broadcast %98 : vector<16x1xf32> to vector<16x16xf32>
    %130 = arith.addf %128, %129 : vector<16x16xf32>
    %cst_100 = arith.constant 0.000000e+00 : f32
    %131 = vector.broadcast %cst_100 : f32 to vector<16x16xf32>
    %132 = arith.maximumf %130, %131 : vector<16x16xf32>
    %133 = vector.extract_strided_slice %99 {offsets = [0, 0, 0], sizes = [1, 16, 8], strides = [1, 1, 1]} : vector<2x16x8xf32> to vector<1x16x8xf32>
    %134 = vector.shape_cast %133 : vector<1x16x8xf32> to vector<16x8xf32>
    %cst_101 = arith.constant dense<0.000000e+00> : vector<16x8xf32>
    %135 = tpu.matmul %132, %134, %cst_101 {dimension_numbers = #tpu.dot_dimension_numbers<[1], [0], [0], [1], [0, 0, 1, 1], [], []>} : vector<16x16xf32>, vector<16x8xf32>, vector<16x8xf32> -> vector<16x8xf32>
    %136 = vector.extract_strided_slice %99 {offsets = [1, 0, 0], sizes = [1, 16, 8], strides = [1, 1, 1]} : vector<2x16x8xf32> to vector<1x16x8xf32>
    %137 = vector.shape_cast %136 : vector<1x16x8xf32> to vector<16x8xf32>
    %cst_102 = arith.constant dense<0.000000e+00> : vector<16x8xf32>
    %138 = tpu.matmul %132, %137, %cst_102 {dimension_numbers = #tpu.dot_dimension_numbers<[1], [0], [0], [1], [0, 0, 1, 1], [], []>} : vector<16x16xf32>, vector<16x8xf32>, vector<16x8xf32> -> vector<16x8xf32>
    %139 = arith.maximumf %135, %138 : vector<16x8xf32>
    %c0_103 = arith.constant 0 : index
    %c0_104 = arith.constant 0 : index
    %c2_105 = arith.constant 2 : index
    %140 = vector.load %arg22[%c0_103, %c0_104, %c2_105] : memref<2x16x12xf32, #tpu.memory_space<vmem>>, vector<1x16x8xf32>
    %141 = vector.shape_cast %140 : vector<1x16x8xf32> to vector<16x8xf32>
    %142 = vector.shape_cast %139 : vector<16x8xf32> to vector<1x16x8xf32>
    tpu.vector_store %arg22[%c0_103, %c0_104, %c2_105], %142 {strides = array<i32>} : memref<2x16x12xf32, #tpu.memory_space<vmem>>, vector<1x16x8xf32>,
    %143 = vector.extract_strided_slice %97 {offsets = [0, 0, 0], sizes = [1, 16, 16], strides = [1, 1, 1]} : vector<5x16x16xf32> to vector<1x16x16xf32>
    %144 = vector.shape_cast %143 : vector<1x16x16xf32> to vector<16x16xf32>
    %c1_106 = arith.constant 1 : index
    %c0_107 = arith.constant 0 : index
    %c0_108 = arith.constant 0 : index
    %145 = vector.load %arg21[%c1_106, %c0_107, %c0_108] : memref<2x16x20xf32, #tpu.memory_space<vmem>>, vector<1x16x16xf32>
    %146 = vector.shape_cast %145 : vector<1x16x16xf32> to vector<16x16xf32>
    %cst_109 = arith.constant dense<0.000000e+00> : vector<16x16xf32>
    %147 = tpu.matmul %144, %146, %cst_109 {dimension_numbers = #tpu.dot_dimension_numbers<[1], [0], [0], [1], [0, 0, 1, 1], [], []>} : vector<16x16xf32>, vector<16x16xf32>, vector<16x16xf32> -> vector<16x16xf32>
    %148 = vector.extract_strided_slice %97 {offsets = [1, 0, 0], sizes = [1, 16, 16], strides = [1, 1, 1]} : vector<5x16x16xf32> to vector<1x16x16xf32>
    %149 = vector.shape_cast %148 : vector<1x16x16xf32> to vector<16x16xf32>
    %c1_110 = arith.constant 1 : index
    %c0_111 = arith.constant 0 : index
    %c1_112 = arith.constant 1 : index
    %150 = vector.load %arg21[%c1_110, %c0_111, %c1_112] : memref<2x16x20xf32, #tpu.memory_space<vmem>>, vector<1x16x16xf32>
    %151 = vector.shape_cast %150 : vector<1x16x16xf32> to vector<16x16xf32>
    %cst_113 = arith.constant dense<0.000000e+00> : vector<16x16xf32>
    %152 = tpu.matmul %149, %151, %cst_113 {dimension_numbers = #tpu.dot_dimension_numbers<[1], [0], [0], [1], [0, 0, 1, 1], [], []>} : vector<16x16xf32>, vector<16x16xf32>, vector<16x16xf32> -> vector<16x16xf32>
    %153 = arith.addf %147, %152 : vector<16x16xf32>
    %154 = vector.extract_strided_slice %97 {offsets = [2, 0, 0], sizes = [1, 16, 16], strides = [1, 1, 1]} : vector<5x16x16xf32> to vector<1x16x16xf32>
    %155 = vector.shape_cast %154 : vector<1x16x16xf32> to vector<16x16xf32>
    %c1_114 = arith.constant 1 : index
    %c0_115 = arith.constant 0 : index
    %c2_116 = arith.constant 2 : index
    %156 = vector.load %arg21[%c1_114, %c0_115, %c2_116] : memref<2x16x20xf32, #tpu.memory_space<vmem>>, vector<1x16x16xf32>
    %157 = vector.shape_cast %156 : vector<1x16x16xf32> to vector<16x16xf32>
    %cst_117 = arith.constant dense<0.000000e+00> : vector<16x16xf32>
    %158 = tpu.matmul %155, %157, %cst_117 {dimension_numbers = #tpu.dot_dimension_numbers<[1], [0], [0], [1], [0, 0, 1, 1], [], []>} : vector<16x16xf32>, vector<16x16xf32>, vector<16x16xf32> -> vector<16x16xf32>
    %159 = arith.addf %153, %158 : vector<16x16xf32>
    %160 = vector.extract_strided_slice %97 {offsets = [3, 0, 0], sizes = [1, 16, 16], strides = [1, 1, 1]} : vector<5x16x16xf32> to vector<1x16x16xf32>
    %161 = vector.shape_cast %160 : vector<1x16x16xf32> to vector<16x16xf32>
    %c1_118 = arith.constant 1 : index
    %c0_119 = arith.constant 0 : index
    %c3_120 = arith.constant 3 : index
    %162 = vector.load %arg21[%c1_118, %c0_119, %c3_120] : memref<2x16x20xf32, #tpu.memory_space<vmem>>, vector<1x16x16xf32>
    %163 = vector.shape_cast %162 : vector<1x16x16xf32> to vector<16x16xf32>
    %cst_121 = arith.constant dense<0.000000e+00> : vector<16x16xf32>
    %164 = tpu.matmul %161, %163, %cst_121 {dimension_numbers = #tpu.dot_dimension_numbers<[1], [0], [0], [1], [0, 0, 1, 1], [], []>} : vector<16x16xf32>, vector<16x16xf32>, vector<16x16xf32> -> vector<16x16xf32>
    %165 = arith.addf %159, %164 : vector<16x16xf32>
    %166 = vector.extract_strided_slice %97 {offsets = [4, 0, 0], sizes = [1, 16, 16], strides = [1, 1, 1]} : vector<5x16x16xf32> to vector<1x16x16xf32>
    %167 = vector.shape_cast %166 : vector<1x16x16xf32> to vector<16x16xf32>
    %c1_122 = arith.constant 1 : index
    %c0_123 = arith.constant 0 : index
    %c4_124 = arith.constant 4 : index
    %168 = vector.load %arg21[%c1_122, %c0_123, %c4_124] : memref<2x16x20xf32, #tpu.memory_space<vmem>>, vector<1x16x16xf32>
    %169 = vector.shape_cast %168 : vector<1x16x16xf32> to vector<16x16xf32>
    %cst_125 = arith.constant dense<0.000000e+00> : vector<16x16xf32>
    %170 = tpu.matmul %167, %169, %cst_125 {dimension_numbers = #tpu.dot_dimension_numbers<[1], [0], [0], [1], [0, 0, 1, 1], [], []>} : vector<16x16xf32>, vector<16x16xf32>, vector<16x16xf32> -> vector<16x16xf32>
    %171 = arith.addf %165, %170 : vector<16x16xf32>
    %172 = vector.broadcast %98 : vector<16x1xf32> to vector<16x16xf32>
    %173 = arith.addf %171, %172 : vector<16x16xf32>
    %cst_126 = arith.constant 0.000000e+00 : f32
    %174 = vector.broadcast %cst_126 : f32 to vector<16x16xf32>
    %175 = arith.maximumf %173, %174 : vector<16x16xf32>
    %176 = vector.extract_strided_slice %99 {offsets = [0, 0, 0], sizes = [1, 16, 8], strides = [1, 1, 1]} : vector<2x16x8xf32> to vector<1x16x8xf32>
    %177 = vector.shape_cast %176 : vector<1x16x8xf32> to vector<16x8xf32>
    %cst_127 = arith.constant dense<0.000000e+00> : vector<16x8xf32>
    %178 = tpu.matmul %175, %177, %cst_127 {dimension_numbers = #tpu.dot_dimension_numbers<[1], [0], [0], [1], [0, 0, 1, 1], [], []>} : vector<16x16xf32>, vector<16x8xf32>, vector<16x8xf32> -> vector<16x8xf32>
    %179 = vector.extract_strided_slice %99 {offsets = [1, 0, 0], sizes = [1, 16, 8], strides = [1, 1, 1]} : vector<2x16x8xf32> to vector<1x16x8xf32>
    %180 = vector.shape_cast %179 : vector<1x16x8xf32> to vector<16x8xf32>
    %cst_128 = arith.constant dense<0.000000e+00> : vector<16x8xf32>
    %181 = tpu.matmul %175, %180, %cst_128 {dimension_numbers = #tpu.dot_dimension_numbers<[1], [0], [0], [1], [0, 0, 1, 1], [], []>} : vector<16x16xf32>, vector<16x8xf32>, vector<16x8xf32> -> vector<16x8xf32>
    %182 = arith.maximumf %178, %181 : vector<16x8xf32>
    %c1_129 = arith.constant 1 : index
    %c0_130 = arith.constant 0 : index
    %c2_131 = arith.constant 2 : index
    %183 = vector.load %arg22[%c1_129, %c0_130, %c2_131] : memref<2x16x12xf32, #tpu.memory_space<vmem>>, vector<1x16x8xf32>
    %184 = vector.shape_cast %183 : vector<1x16x8xf32> to vector<16x8xf32>
    %185 = vector.shape_cast %182 : vector<16x8xf32> to vector<1x16x8xf32>
    tpu.vector_store %arg22[%c1_129, %c0_130, %c2_131], %185 {strides = array<i32>} : memref<2x16x12xf32, #tpu.memory_space<vmem>>, vector<1x16x8xf32>,
    %c0_132 = arith.constant 0 : index
    %c0_133 = arith.constant 0 : index
    %c0_134 = arith.constant 0 : index
    %186 = vector.load %arg9[%c0_132, %c0_133, %c0_134] : memref<5x16x16xf32, #tpu.memory_space<vmem>>, vector<5x16x16xf32>
    %c0_135 = arith.constant 0 : index
    %c0_136 = arith.constant 0 : index
    %187 = vector.load %arg10[%c0_135, %c0_136] : memref<16x1xf32, #tpu.memory_space<vmem>>, vector<16x1xf32>
    %c0_137 = arith.constant 0 : index
    %c0_138 = arith.constant 0 : index
    %c0_139 = arith.constant 0 : index
    %188 = vector.load %arg11[%c0_137, %c0_138, %c0_139] : memref<2x8x4xf32, #tpu.memory_space<vmem>>, vector<2x8x4xf32>
    %189 = vector.extract_strided_slice %186 {offsets = [0, 0, 0], sizes = [1, 16, 16], strides = [1, 1, 1]} : vector<5x16x16xf32> to vector<1x16x16xf32>
    %190 = vector.shape_cast %189 : vector<1x16x16xf32> to vector<16x16xf32>
    %c0_140 = arith.constant 0 : index
    %c0_141 = arith.constant 0 : index
    %c0_142 = arith.constant 0 : index
    %191 = vector.load %arg22[%c0_140, %c0_141, %c0_142] : memref<2x16x12xf32, #tpu.memory_space<vmem>>, vector<1x16x8xf32>
    %192 = vector.shape_cast %191 : vector<1x16x8xf32> to vector<16x8xf32>
    %cst_143 = arith.constant dense<0.000000e+00> : vector<16x8xf32>
    %193 = tpu.matmul %190, %192, %cst_143 {dimension_numbers = #tpu.dot_dimension_numbers<[1], [0], [0], [1], [0, 0, 1, 1], [], []>} : vector<16x16xf32>, vector<16x8xf32>, vector<16x8xf32> -> vector<16x8xf32>
    %194 = vector.extract_strided_slice %186 {offsets = [1, 0, 0], sizes = [1, 16, 16], strides = [1, 1, 1]} : vector<5x16x16xf32> to vector<1x16x16xf32>
    %195 = vector.shape_cast %194 : vector<1x16x16xf32> to vector<16x16xf32>
    %c0_144 = arith.constant 0 : index
    %c0_145 = arith.constant 0 : index
    %c1_146 = arith.constant 1 : index
    %196 = vector.load %arg22[%c0_144, %c0_145, %c1_146] : memref<2x16x12xf32, #tpu.memory_space<vmem>>, vector<1x16x8xf32>
    %197 = vector.shape_cast %196 : vector<1x16x8xf32> to vector<16x8xf32>
    %cst_147 = arith.constant dense<0.000000e+00> : vector<16x8xf32>
    %198 = tpu.matmul %195, %197, %cst_147 {dimension_numbers = #tpu.dot_dimension_numbers<[1], [0], [0], [1], [0, 0, 1, 1], [], []>} : vector<16x16xf32>, vector<16x8xf32>, vector<16x8xf32> -> vector<16x8xf32>
    %199 = arith.addf %193, %198 : vector<16x8xf32>
    %200 = vector.extract_strided_slice %186 {offsets = [2, 0, 0], sizes = [1, 16, 16], strides = [1, 1, 1]} : vector<5x16x16xf32> to vector<1x16x16xf32>
    %201 = vector.shape_cast %200 : vector<1x16x16xf32> to vector<16x16xf32>
    %c0_148 = arith.constant 0 : index
    %c0_149 = arith.constant 0 : index
    %c2_150 = arith.constant 2 : index
    %202 = vector.load %arg22[%c0_148, %c0_149, %c2_150] : memref<2x16x12xf32, #tpu.memory_space<vmem>>, vector<1x16x8xf32>
    %203 = vector.shape_cast %202 : vector<1x16x8xf32> to vector<16x8xf32>
    %cst_151 = arith.constant dense<0.000000e+00> : vector<16x8xf32>
    %204 = tpu.matmul %201, %203, %cst_151 {dimension_numbers = #tpu.dot_dimension_numbers<[1], [0], [0], [1], [0, 0, 1, 1], [], []>} : vector<16x16xf32>, vector<16x8xf32>, vector<16x8xf32> -> vector<16x8xf32>
    %205 = arith.addf %199, %204 : vector<16x8xf32>
    %206 = vector.extract_strided_slice %186 {offsets = [3, 0, 0], sizes = [1, 16, 16], strides = [1, 1, 1]} : vector<5x16x16xf32> to vector<1x16x16xf32>
    %207 = vector.shape_cast %206 : vector<1x16x16xf32> to vector<16x16xf32>
    %c0_152 = arith.constant 0 : index
    %c0_153 = arith.constant 0 : index
    %c3_154 = arith.constant 3 : index
    %208 = vector.load %arg22[%c0_152, %c0_153, %c3_154] : memref<2x16x12xf32, #tpu.memory_space<vmem>>, vector<1x16x8xf32>
    %209 = vector.shape_cast %208 : vector<1x16x8xf32> to vector<16x8xf32>
    %cst_155 = arith.constant dense<0.000000e+00> : vector<16x8xf32>
    %210 = tpu.matmul %207, %209, %cst_155 {dimension_numbers = #tpu.dot_dimension_numbers<[1], [0], [0], [1], [0, 0, 1, 1], [], []>} : vector<16x16xf32>, vector<16x8xf32>, vector<16x8xf32> -> vector<16x8xf32>
    %211 = arith.addf %205, %210 : vector<16x8xf32>
    %212 = vector.extract_strided_slice %186 {offsets = [4, 0, 0], sizes = [1, 16, 16], strides = [1, 1, 1]} : vector<5x16x16xf32> to vector<1x16x16xf32>
    %213 = vector.shape_cast %212 : vector<1x16x16xf32> to vector<16x16xf32>
    %c0_156 = arith.constant 0 : index
    %c0_157 = arith.constant 0 : index
    %c4_158 = arith.constant 4 : index
    %214 = vector.load %arg22[%c0_156, %c0_157, %c4_158] : memref<2x16x12xf32, #tpu.memory_space<vmem>>, vector<1x16x8xf32>
    %215 = vector.shape_cast %214 : vector<1x16x8xf32> to vector<16x8xf32>
    %cst_159 = arith.constant dense<0.000000e+00> : vector<16x8xf32>
    %216 = tpu.matmul %213, %215, %cst_159 {dimension_numbers = #tpu.dot_dimension_numbers<[1], [0], [0], [1], [0, 0, 1, 1], [], []>} : vector<16x16xf32>, vector<16x8xf32>, vector<16x8xf32> -> vector<16x8xf32>
    %217 = arith.addf %211, %216 : vector<16x8xf32>
    %218 = vector.broadcast %187 : vector<16x1xf32> to vector<16x8xf32>
    %219 = arith.addf %217, %218 : vector<16x8xf32>
    %cst_160 = arith.constant 0.000000e+00 : f32
    %220 = vector.broadcast %cst_160 : f32 to vector<16x8xf32>
    %221 = arith.maximumf %219, %220 : vector<16x8xf32>
    %222 = vector.extract_strided_slice %188 {offsets = [0, 0, 0], sizes = [1, 8, 4], strides = [1, 1, 1]} : vector<2x8x4xf32> to vector<1x8x4xf32>
    %223 = vector.shape_cast %222 : vector<1x8x4xf32> to vector<8x4xf32>
    %cst_161 = arith.constant dense<0.000000e+00> : vector<16x4xf32>
    %224 = tpu.matmul %221, %223, %cst_161 {dimension_numbers = #tpu.dot_dimension_numbers<[1], [0], [0], [1], [0, 0, 1, 1], [], []>} : vector<16x8xf32>, vector<8x4xf32>, vector<16x4xf32> -> vector<16x4xf32>
    %225 = vector.extract_strided_slice %188 {offsets = [1, 0, 0], sizes = [1, 8, 4], strides = [1, 1, 1]} : vector<2x8x4xf32> to vector<1x8x4xf32>
    %226 = vector.shape_cast %225 : vector<1x8x4xf32> to vector<8x4xf32>
    %cst_162 = arith.constant dense<0.000000e+00> : vector<16x4xf32>
    %227 = tpu.matmul %221, %226, %cst_162 {dimension_numbers = #tpu.dot_dimension_numbers<[1], [0], [0], [1], [0, 0, 1, 1], [], []>} : vector<16x8xf32>, vector<8x4xf32>, vector<16x4xf32> -> vector<16x4xf32>
    %228 = arith.maximumf %224, %227 : vector<16x4xf32>
    %c0_163 = arith.constant 0 : index
    %c0_164 = arith.constant 0 : index
    %c0_165 = arith.constant 0 : index
    %229 = vector.load %arg23[%c0_163, %c0_164, %c0_165] : memref<2x16x4xf32, #tpu.memory_space<vmem>>, vector<1x16x4xf32>
    %230 = vector.shape_cast %229 : vector<1x16x4xf32> to vector<16x4xf32>
    %231 = vector.shape_cast %228 : vector<16x4xf32> to vector<1x16x4xf32>
    tpu.vector_store %arg23[%c0_163, %c0_164, %c0_165], %231 {strides = array<i32>} : memref<2x16x4xf32, #tpu.memory_space<vmem>>, vector<1x16x4xf32>,
    %232 = vector.extract_strided_slice %186 {offsets = [0, 0, 0], sizes = [1, 16, 16], strides = [1, 1, 1]} : vector<5x16x16xf32> to vector<1x16x16xf32>
    %233 = vector.shape_cast %232 : vector<1x16x16xf32> to vector<16x16xf32>
    %c1_166 = arith.constant 1 : index
    %c0_167 = arith.constant 0 : index
    %c0_168 = arith.constant 0 : index
    %234 = vector.load %arg22[%c1_166, %c0_167, %c0_168] : memref<2x16x12xf32, #tpu.memory_space<vmem>>, vector<1x16x8xf32>
    %235 = vector.shape_cast %234 : vector<1x16x8xf32> to vector<16x8xf32>
    %cst_169 = arith.constant dense<0.000000e+00> : vector<16x8xf32>
    %236 = tpu.matmul %233, %235, %cst_169 {dimension_numbers = #tpu.dot_dimension_numbers<[1], [0], [0], [1], [0, 0, 1, 1], [], []>} : vector<16x16xf32>, vector<16x8xf32>, vector<16x8xf32> -> vector<16x8xf32>
    %237 = vector.extract_strided_slice %186 {offsets = [1, 0, 0], sizes = [1, 16, 16], strides = [1, 1, 1]} : vector<5x16x16xf32> to vector<1x16x16xf32>
    %238 = vector.shape_cast %237 : vector<1x16x16xf32> to vector<16x16xf32>
    %c1_170 = arith.constant 1 : index
    %c0_171 = arith.constant 0 : index
    %c1_172 = arith.constant 1 : index
    %239 = vector.load %arg22[%c1_170, %c0_171, %c1_172] : memref<2x16x12xf32, #tpu.memory_space<vmem>>, vector<1x16x8xf32>
    %240 = vector.shape_cast %239 : vector<1x16x8xf32> to vector<16x8xf32>
    %cst_173 = arith.constant dense<0.000000e+00> : vector<16x8xf32>
    %241 = tpu.matmul %238, %240, %cst_173 {dimension_numbers = #tpu.dot_dimension_numbers<[1], [0], [0], [1], [0, 0, 1, 1], [], []>} : vector<16x16xf32>, vector<16x8xf32>, vector<16x8xf32> -> vector<16x8xf32>
    %242 = arith.addf %236, %241 : vector<16x8xf32>
    %243 = vector.extract_strided_slice %186 {offsets = [2, 0, 0], sizes = [1, 16, 16], strides = [1, 1, 1]} : vector<5x16x16xf32> to vector<1x16x16xf32>
    %244 = vector.shape_cast %243 : vector<1x16x16xf32> to vector<16x16xf32>
    %c1_174 = arith.constant 1 : index
    %c0_175 = arith.constant 0 : index
    %c2_176 = arith.constant 2 : index
    %245 = vector.load %arg22[%c1_174, %c0_175, %c2_176] : memref<2x16x12xf32, #tpu.memory_space<vmem>>, vector<1x16x8xf32>
    %246 = vector.shape_cast %245 : vector<1x16x8xf32> to vector<16x8xf32>
    %cst_177 = arith.constant dense<0.000000e+00> : vector<16x8xf32>
    %247 = tpu.matmul %244, %246, %cst_177 {dimension_numbers = #tpu.dot_dimension_numbers<[1], [0], [0], [1], [0, 0, 1, 1], [], []>} : vector<16x16xf32>, vector<16x8xf32>, vector<16x8xf32> -> vector<16x8xf32>
    %248 = arith.addf %242, %247 : vector<16x8xf32>
    %249 = vector.extract_strided_slice %186 {offsets = [3, 0, 0], sizes = [1, 16, 16], strides = [1, 1, 1]} : vector<5x16x16xf32> to vector<1x16x16xf32>
    %250 = vector.shape_cast %249 : vector<1x16x16xf32> to vector<16x16xf32>
    %c1_178 = arith.constant 1 : index
    %c0_179 = arith.constant 0 : index
    %c3_180 = arith.constant 3 : index
    %251 = vector.load %arg22[%c1_178, %c0_179, %c3_180] : memref<2x16x12xf32, #tpu.memory_space<vmem>>, vector<1x16x8xf32>
    %252 = vector.shape_cast %251 : vector<1x16x8xf32> to vector<16x8xf32>
    %cst_181 = arith.constant dense<0.000000e+00> : vector<16x8xf32>
    %253 = tpu.matmul %250, %252, %cst_181 {dimension_numbers = #tpu.dot_dimension_numbers<[1], [0], [0], [1], [0, 0, 1, 1], [], []>} : vector<16x16xf32>, vector<16x8xf32>, vector<16x8xf32> -> vector<16x8xf32>
    %254 = arith.addf %248, %253 : vector<16x8xf32>
    %255 = vector.extract_strided_slice %186 {offsets = [4, 0, 0], sizes = [1, 16, 16], strides = [1, 1, 1]} : vector<5x16x16xf32> to vector<1x16x16xf32>
    %256 = vector.shape_cast %255 : vector<1x16x16xf32> to vector<16x16xf32>
    %c1_182 = arith.constant 1 : index
    %c0_183 = arith.constant 0 : index
    %c4_184 = arith.constant 4 : index
    %257 = vector.load %arg22[%c1_182, %c0_183, %c4_184] : memref<2x16x12xf32, #tpu.memory_space<vmem>>, vector<1x16x8xf32>
    %258 = vector.shape_cast %257 : vector<1x16x8xf32> to vector<16x8xf32>
    %cst_185 = arith.constant dense<0.000000e+00> : vector<16x8xf32>
    %259 = tpu.matmul %256, %258, %cst_185 {dimension_numbers = #tpu.dot_dimension_numbers<[1], [0], [0], [1], [0, 0, 1, 1], [], []>} : vector<16x16xf32>, vector<16x8xf32>, vector<16x8xf32> -> vector<16x8xf32>
    %260 = arith.addf %254, %259 : vector<16x8xf32>
    %261 = vector.broadcast %187 : vector<16x1xf32> to vector<16x8xf32>
    %262 = arith.addf %260, %261 : vector<16x8xf32>
    %cst_186 = arith.constant 0.000000e+00 : f32
    %263 = vector.broadcast %cst_186 : f32 to vector<16x8xf32>
    %264 = arith.maximumf %262, %263 : vector<16x8xf32>
    %265 = vector.extract_strided_slice %188 {offsets = [0, 0, 0], sizes = [1, 8, 4], strides = [1, 1, 1]} : vector<2x8x4xf32> to vector<1x8x4xf32>
    %266 = vector.shape_cast %265 : vector<1x8x4xf32> to vector<8x4xf32>
    %cst_187 = arith.constant dense<0.000000e+00> : vector<16x4xf32>
    %267 = tpu.matmul %264, %266, %cst_187 {dimension_numbers = #tpu.dot_dimension_numbers<[1], [0], [0], [1], [0, 0, 1, 1], [], []>} : vector<16x8xf32>, vector<8x4xf32>, vector<16x4xf32> -> vector<16x4xf32>
    %268 = vector.extract_strided_slice %188 {offsets = [1, 0, 0], sizes = [1, 8, 4], strides = [1, 1, 1]} : vector<2x8x4xf32> to vector<1x8x4xf32>
    %269 = vector.shape_cast %268 : vector<1x8x4xf32> to vector<8x4xf32>
    %cst_188 = arith.constant dense<0.000000e+00> : vector<16x4xf32>
    %270 = tpu.matmul %264, %269, %cst_188 {dimension_numbers = #tpu.dot_dimension_numbers<[1], [0], [0], [1], [0, 0, 1, 1], [], []>} : vector<16x8xf32>, vector<8x4xf32>, vector<16x4xf32> -> vector<16x4xf32>
    %271 = arith.maximumf %267, %270 : vector<16x4xf32>
    %c1_189 = arith.constant 1 : index
    %c0_190 = arith.constant 0 : index
    %c0_191 = arith.constant 0 : index
    %272 = vector.load %arg23[%c1_189, %c0_190, %c0_191] : memref<2x16x4xf32, #tpu.memory_space<vmem>>, vector<1x16x4xf32>
    %273 = vector.shape_cast %272 : vector<1x16x4xf32> to vector<16x4xf32>
    %274 = vector.shape_cast %271 : vector<16x4xf32> to vector<1x16x4xf32>
    tpu.vector_store %arg23[%c1_189, %c0_190, %c0_191], %274 {strides = array<i32>} : memref<2x16x4xf32, #tpu.memory_space<vmem>>, vector<1x16x4xf32>,
    %c0_192 = arith.constant 0 : index
    %c0_193 = arith.constant 0 : index
    %275 = vector.load %arg2[%c0_192, %c0_193] : memref<2x8xf32, #tpu.memory_space<vmem>>, vector<2x8xf32>
    %c0_194 = arith.constant 0 : index
    %c0_195 = arith.constant 0 : index
    %276 = vector.load %arg13[%c0_194, %c0_195] : memref<8x32xf32, #tpu.memory_space<vmem>>, vector<8x32xf32>
    %cst_196 = arith.constant dense<0.000000e+00> : vector<2x32xf32>
    %277 = tpu.matmul %275, %276, %cst_196 {dimension_numbers = #tpu.dot_dimension_numbers<[1], [0], [0], [1], [0, 0, 1, 1], [], []>} : vector<2x8xf32>, vector<8x32xf32>, vector<2x32xf32> -> vector<2x32xf32>
    %c0_197 = arith.constant 0 : index
    %c0_198 = arith.constant 0 : index
    %c0_199 = arith.constant 0 : index
    %278 = vector.load %arg12[%c0_197, %c0_198, %c0_199] : memref<16x4x32xf32, #tpu.memory_space<vmem>>, vector<16x4x32xf32>
    %c0_200 = arith.constant 0 : index
    %c0_201 = arith.constant 0 : index
    %c0_202 = arith.constant 0 : index
    %279 = vector.load %arg23[%c0_200, %c0_201, %c0_202] : memref<2x16x4xf32, #tpu.memory_space<vmem>>, vector<2x1x4xf32>
    %280 = vector.shape_cast %279 : vector<2x1x4xf32> to vector<2x4xf32>
    %281 = vector.extract_strided_slice %278 {offsets = [0, 0, 0], sizes = [1, 4, 32], strides = [1, 1, 1]} : vector<16x4x32xf32> to vector<1x4x32xf32>
    %282 = vector.shape_cast %281 : vector<1x4x32xf32> to vector<4x32xf32>
    %cst_203 = arith.constant dense<0.000000e+00> : vector<2x32xf32>
    %283 = tpu.matmul %280, %282, %cst_203 {dimension_numbers = #tpu.dot_dimension_numbers<[1], [0], [0], [1], [0, 0, 1, 1], [], []>} : vector<2x4xf32>, vector<4x32xf32>, vector<2x32xf32> -> vector<2x32xf32>
    %284 = arith.addf %277, %283 : vector<2x32xf32>
    %c0_204 = arith.constant 0 : index
    %c1_205 = arith.constant 1 : index
    %c0_206 = arith.constant 0 : index
    %285 = vector.load %arg23[%c0_204, %c1_205, %c0_206] : memref<2x16x4xf32, #tpu.memory_space<vmem>>, vector<2x1x4xf32>
    %286 = vector.shape_cast %285 : vector<2x1x4xf32> to vector<2x4xf32>
    %287 = vector.extract_strided_slice %278 {offsets = [1, 0, 0], sizes = [1, 4, 32], strides = [1, 1, 1]} : vector<16x4x32xf32> to vector<1x4x32xf32>
    %288 = vector.shape_cast %287 : vector<1x4x32xf32> to vector<4x32xf32>
    %cst_207 = arith.constant dense<0.000000e+00> : vector<2x32xf32>
    %289 = tpu.matmul %286, %288, %cst_207 {dimension_numbers = #tpu.dot_dimension_numbers<[1], [0], [0], [1], [0, 0, 1, 1], [], []>} : vector<2x4xf32>, vector<4x32xf32>, vector<2x32xf32> -> vector<2x32xf32>
    %290 = arith.addf %284, %289 : vector<2x32xf32>
    %c0_208 = arith.constant 0 : index
    %c2_209 = arith.constant 2 : index
    %c0_210 = arith.constant 0 : index
    %291 = vector.load %arg23[%c0_208, %c2_209, %c0_210] : memref<2x16x4xf32, #tpu.memory_space<vmem>>, vector<2x1x4xf32>
    %292 = vector.shape_cast %291 : vector<2x1x4xf32> to vector<2x4xf32>
    %293 = vector.extract_strided_slice %278 {offsets = [2, 0, 0], sizes = [1, 4, 32], strides = [1, 1, 1]} : vector<16x4x32xf32> to vector<1x4x32xf32>
    %294 = vector.shape_cast %293 : vector<1x4x32xf32> to vector<4x32xf32>
    %cst_211 = arith.constant dense<0.000000e+00> : vector<2x32xf32>
    %295 = tpu.matmul %292, %294, %cst_211 {dimension_numbers = #tpu.dot_dimension_numbers<[1], [0], [0], [1], [0, 0, 1, 1], [], []>} : vector<2x4xf32>, vector<4x32xf32>, vector<2x32xf32> -> vector<2x32xf32>
    %296 = arith.addf %290, %295 : vector<2x32xf32>
    %c0_212 = arith.constant 0 : index
    %c3_213 = arith.constant 3 : index
    %c0_214 = arith.constant 0 : index
    %297 = vector.load %arg23[%c0_212, %c3_213, %c0_214] : memref<2x16x4xf32, #tpu.memory_space<vmem>>, vector<2x1x4xf32>
    %298 = vector.shape_cast %297 : vector<2x1x4xf32> to vector<2x4xf32>
    %299 = vector.extract_strided_slice %278 {offsets = [3, 0, 0], sizes = [1, 4, 32], strides = [1, 1, 1]} : vector<16x4x32xf32> to vector<1x4x32xf32>
    %300 = vector.shape_cast %299 : vector<1x4x32xf32> to vector<4x32xf32>
    %cst_215 = arith.constant dense<0.000000e+00> : vector<2x32xf32>
    %301 = tpu.matmul %298, %300, %cst_215 {dimension_numbers = #tpu.dot_dimension_numbers<[1], [0], [0], [1], [0, 0, 1, 1], [], []>} : vector<2x4xf32>, vector<4x32xf32>, vector<2x32xf32> -> vector<2x32xf32>
    %302 = arith.addf %296, %301 : vector<2x32xf32>
    %c0_216 = arith.constant 0 : index
    %c4_217 = arith.constant 4 : index
    %c0_218 = arith.constant 0 : index
    %303 = vector.load %arg23[%c0_216, %c4_217, %c0_218] : memref<2x16x4xf32, #tpu.memory_space<vmem>>, vector<2x1x4xf32>
    %304 = vector.shape_cast %303 : vector<2x1x4xf32> to vector<2x4xf32>
    %305 = vector.extract_strided_slice %278 {offsets = [4, 0, 0], sizes = [1, 4, 32], strides = [1, 1, 1]} : vector<16x4x32xf32> to vector<1x4x32xf32>
    %306 = vector.shape_cast %305 : vector<1x4x32xf32> to vector<4x32xf32>
    %cst_219 = arith.constant dense<0.000000e+00> : vector<2x32xf32>
    %307 = tpu.matmul %304, %306, %cst_219 {dimension_numbers = #tpu.dot_dimension_numbers<[1], [0], [0], [1], [0, 0, 1, 1], [], []>} : vector<2x4xf32>, vector<4x32xf32>, vector<2x32xf32> -> vector<2x32xf32>
    %308 = arith.addf %302, %307 : vector<2x32xf32>
    %c0_220 = arith.constant 0 : index
    %c5 = arith.constant 5 : index
    %c0_221 = arith.constant 0 : index
    %309 = vector.load %arg23[%c0_220, %c5, %c0_221] : memref<2x16x4xf32, #tpu.memory_space<vmem>>, vector<2x1x4xf32>
    %310 = vector.shape_cast %309 : vector<2x1x4xf32> to vector<2x4xf32>
    %311 = vector.extract_strided_slice %278 {offsets = [5, 0, 0], sizes = [1, 4, 32], strides = [1, 1, 1]} : vector<16x4x32xf32> to vector<1x4x32xf32>
    %312 = vector.shape_cast %311 : vector<1x4x32xf32> to vector<4x32xf32>
    %cst_222 = arith.constant dense<0.000000e+00> : vector<2x32xf32>
    %313 = tpu.matmul %310, %312, %cst_222 {dimension_numbers = #tpu.dot_dimension_numbers<[1], [0], [0], [1], [0, 0, 1, 1], [], []>} : vector<2x4xf32>, vector<4x32xf32>, vector<2x32xf32> -> vector<2x32xf32>
    %314 = arith.addf %308, %313 : vector<2x32xf32>
    %c0_223 = arith.constant 0 : index
    %c6 = arith.constant 6 : index
    %c0_224 = arith.constant 0 : index
    %315 = vector.load %arg23[%c0_223, %c6, %c0_224] : memref<2x16x4xf32, #tpu.memory_space<vmem>>, vector<2x1x4xf32>
    %316 = vector.shape_cast %315 : vector<2x1x4xf32> to vector<2x4xf32>
    %317 = vector.extract_strided_slice %278 {offsets = [6, 0, 0], sizes = [1, 4, 32], strides = [1, 1, 1]} : vector<16x4x32xf32> to vector<1x4x32xf32>
    %318 = vector.shape_cast %317 : vector<1x4x32xf32> to vector<4x32xf32>
    %cst_225 = arith.constant dense<0.000000e+00> : vector<2x32xf32>
    %319 = tpu.matmul %316, %318, %cst_225 {dimension_numbers = #tpu.dot_dimension_numbers<[1], [0], [0], [1], [0, 0, 1, 1], [], []>} : vector<2x4xf32>, vector<4x32xf32>, vector<2x32xf32> -> vector<2x32xf32>
    %320 = arith.addf %314, %319 : vector<2x32xf32>
    %c0_226 = arith.constant 0 : index
    %c7 = arith.constant 7 : index
    %c0_227 = arith.constant 0 : index
    %321 = vector.load %arg23[%c0_226, %c7, %c0_227] : memref<2x16x4xf32, #tpu.memory_space<vmem>>, vector<2x1x4xf32>
    %322 = vector.shape_cast %321 : vector<2x1x4xf32> to vector<2x4xf32>
    %323 = vector.extract_strided_slice %278 {offsets = [7, 0, 0], sizes = [1, 4, 32], strides = [1, 1, 1]} : vector<16x4x32xf32> to vector<1x4x32xf32>
    %324 = vector.shape_cast %323 : vector<1x4x32xf32> to vector<4x32xf32>
    %cst_228 = arith.constant dense<0.000000e+00> : vector<2x32xf32>
    %325 = tpu.matmul %322, %324, %cst_228 {dimension_numbers = #tpu.dot_dimension_numbers<[1], [0], [0], [1], [0, 0, 1, 1], [], []>} : vector<2x4xf32>, vector<4x32xf32>, vector<2x32xf32> -> vector<2x32xf32>
    %326 = arith.addf %320, %325 : vector<2x32xf32>
    %c0_229 = arith.constant 0 : index
    %c8 = arith.constant 8 : index
    %c0_230 = arith.constant 0 : index
    %327 = vector.load %arg23[%c0_229, %c8, %c0_230] : memref<2x16x4xf32, #tpu.memory_space<vmem>>, vector<2x1x4xf32>
    %328 = vector.shape_cast %327 : vector<2x1x4xf32> to vector<2x4xf32>
    %329 = vector.extract_strided_slice %278 {offsets = [8, 0, 0], sizes = [1, 4, 32], strides = [1, 1, 1]} : vector<16x4x32xf32> to vector<1x4x32xf32>
    %330 = vector.shape_cast %329 : vector<1x4x32xf32> to vector<4x32xf32>
    %cst_231 = arith.constant dense<0.000000e+00> : vector<2x32xf32>
    %331 = tpu.matmul %328, %330, %cst_231 {dimension_numbers = #tpu.dot_dimension_numbers<[1], [0], [0], [1], [0, 0, 1, 1], [], []>} : vector<2x4xf32>, vector<4x32xf32>, vector<2x32xf32> -> vector<2x32xf32>
    %332 = arith.addf %326, %331 : vector<2x32xf32>
    %c0_232 = arith.constant 0 : index
    %c9 = arith.constant 9 : index
    %c0_233 = arith.constant 0 : index
    %333 = vector.load %arg23[%c0_232, %c9, %c0_233] : memref<2x16x4xf32, #tpu.memory_space<vmem>>, vector<2x1x4xf32>
    %334 = vector.shape_cast %333 : vector<2x1x4xf32> to vector<2x4xf32>
    %335 = vector.extract_strided_slice %278 {offsets = [9, 0, 0], sizes = [1, 4, 32], strides = [1, 1, 1]} : vector<16x4x32xf32> to vector<1x4x32xf32>
    %336 = vector.shape_cast %335 : vector<1x4x32xf32> to vector<4x32xf32>
    %cst_234 = arith.constant dense<0.000000e+00> : vector<2x32xf32>
    %337 = tpu.matmul %334, %336, %cst_234 {dimension_numbers = #tpu.dot_dimension_numbers<[1], [0], [0], [1], [0, 0, 1, 1], [], []>} : vector<2x4xf32>, vector<4x32xf32>, vector<2x32xf32> -> vector<2x32xf32>
    %338 = arith.addf %332, %337 : vector<2x32xf32>
    %c0_235 = arith.constant 0 : index
    %c10 = arith.constant 10 : index
    %c0_236 = arith.constant 0 : index
    %339 = vector.load %arg23[%c0_235, %c10, %c0_236] : memref<2x16x4xf32, #tpu.memory_space<vmem>>, vector<2x1x4xf32>
    %340 = vector.shape_cast %339 : vector<2x1x4xf32> to vector<2x4xf32>
    %341 = vector.extract_strided_slice %278 {offsets = [10, 0, 0], sizes = [1, 4, 32], strides = [1, 1, 1]} : vector<16x4x32xf32> to vector<1x4x32xf32>
    %342 = vector.shape_cast %341 : vector<1x4x32xf32> to vector<4x32xf32>
    %cst_237 = arith.constant dense<0.000000e+00> : vector<2x32xf32>
    %343 = tpu.matmul %340, %342, %cst_237 {dimension_numbers = #tpu.dot_dimension_numbers<[1], [0], [0], [1], [0, 0, 1, 1], [], []>} : vector<2x4xf32>, vector<4x32xf32>, vector<2x32xf32> -> vector<2x32xf32>
    %344 = arith.addf %338, %343 : vector<2x32xf32>
    %c0_238 = arith.constant 0 : index
    %c11 = arith.constant 11 : index
    %c0_239 = arith.constant 0 : index
    %345 = vector.load %arg23[%c0_238, %c11, %c0_239] : memref<2x16x4xf32, #tpu.memory_space<vmem>>, vector<2x1x4xf32>
    %346 = vector.shape_cast %345 : vector<2x1x4xf32> to vector<2x4xf32>
    %347 = vector.extract_strided_slice %278 {offsets = [11, 0, 0], sizes = [1, 4, 32], strides = [1, 1, 1]} : vector<16x4x32xf32> to vector<1x4x32xf32>
    %348 = vector.shape_cast %347 : vector<1x4x32xf32> to vector<4x32xf32>
    %cst_240 = arith.constant dense<0.000000e+00> : vector<2x32xf32>
    %349 = tpu.matmul %346, %348, %cst_240 {dimension_numbers = #tpu.dot_dimension_numbers<[1], [0], [0], [1], [0, 0, 1, 1], [], []>} : vector<2x4xf32>, vector<4x32xf32>, vector<2x32xf32> -> vector<2x32xf32>
    %350 = arith.addf %344, %349 : vector<2x32xf32>
    %c0_241 = arith.constant 0 : index
    %c12 = arith.constant 12 : index
    %c0_242 = arith.constant 0 : index
    %351 = vector.load %arg23[%c0_241, %c12, %c0_242] : memref<2x16x4xf32, #tpu.memory_space<vmem>>, vector<2x1x4xf32>
    %352 = vector.shape_cast %351 : vector<2x1x4xf32> to vector<2x4xf32>
    %353 = vector.extract_strided_slice %278 {offsets = [12, 0, 0], sizes = [1, 4, 32], strides = [1, 1, 1]} : vector<16x4x32xf32> to vector<1x4x32xf32>
    %354 = vector.shape_cast %353 : vector<1x4x32xf32> to vector<4x32xf32>
    %cst_243 = arith.constant dense<0.000000e+00> : vector<2x32xf32>
    %355 = tpu.matmul %352, %354, %cst_243 {dimension_numbers = #tpu.dot_dimension_numbers<[1], [0], [0], [1], [0, 0, 1, 1], [], []>} : vector<2x4xf32>, vector<4x32xf32>, vector<2x32xf32> -> vector<2x32xf32>
    %356 = arith.addf %350, %355 : vector<2x32xf32>
    %c0_244 = arith.constant 0 : index
    %c13 = arith.constant 13 : index
    %c0_245 = arith.constant 0 : index
    %357 = vector.load %arg23[%c0_244, %c13, %c0_245] : memref<2x16x4xf32, #tpu.memory_space<vmem>>, vector<2x1x4xf32>
    %358 = vector.shape_cast %357 : vector<2x1x4xf32> to vector<2x4xf32>
    %359 = vector.extract_strided_slice %278 {offsets = [13, 0, 0], sizes = [1, 4, 32], strides = [1, 1, 1]} : vector<16x4x32xf32> to vector<1x4x32xf32>
    %360 = vector.shape_cast %359 : vector<1x4x32xf32> to vector<4x32xf32>
    %cst_246 = arith.constant dense<0.000000e+00> : vector<2x32xf32>
    %361 = tpu.matmul %358, %360, %cst_246 {dimension_numbers = #tpu.dot_dimension_numbers<[1], [0], [0], [1], [0, 0, 1, 1], [], []>} : vector<2x4xf32>, vector<4x32xf32>, vector<2x32xf32> -> vector<2x32xf32>
    %362 = arith.addf %356, %361 : vector<2x32xf32>
    %c0_247 = arith.constant 0 : index
    %c14 = arith.constant 14 : index
    %c0_248 = arith.constant 0 : index
    %363 = vector.load %arg23[%c0_247, %c14, %c0_248] : memref<2x16x4xf32, #tpu.memory_space<vmem>>, vector<2x1x4xf32>
    %364 = vector.shape_cast %363 : vector<2x1x4xf32> to vector<2x4xf32>
    %365 = vector.extract_strided_slice %278 {offsets = [14, 0, 0], sizes = [1, 4, 32], strides = [1, 1, 1]} : vector<16x4x32xf32> to vector<1x4x32xf32>
    %366 = vector.shape_cast %365 : vector<1x4x32xf32> to vector<4x32xf32>
    %cst_249 = arith.constant dense<0.000000e+00> : vector<2x32xf32>
    %367 = tpu.matmul %364, %366, %cst_249 {dimension_numbers = #tpu.dot_dimension_numbers<[1], [0], [0], [1], [0, 0, 1, 1], [], []>} : vector<2x4xf32>, vector<4x32xf32>, vector<2x32xf32> -> vector<2x32xf32>
    %368 = arith.addf %362, %367 : vector<2x32xf32>
    %c0_250 = arith.constant 0 : index
    %c15 = arith.constant 15 : index
    %c0_251 = arith.constant 0 : index
    %369 = vector.load %arg23[%c0_250, %c15, %c0_251] : memref<2x16x4xf32, #tpu.memory_space<vmem>>, vector<2x1x4xf32>
    %370 = vector.shape_cast %369 : vector<2x1x4xf32> to vector<2x4xf32>
    %371 = vector.extract_strided_slice %278 {offsets = [15, 0, 0], sizes = [1, 4, 32], strides = [1, 1, 1]} : vector<16x4x32xf32> to vector<1x4x32xf32>
    %372 = vector.shape_cast %371 : vector<1x4x32xf32> to vector<4x32xf32>
    %cst_252 = arith.constant dense<0.000000e+00> : vector<2x32xf32>
    %373 = tpu.matmul %370, %372, %cst_252 {dimension_numbers = #tpu.dot_dimension_numbers<[1], [0], [0], [1], [0, 0, 1, 1], [], []>} : vector<2x4xf32>, vector<4x32xf32>, vector<2x32xf32> -> vector<2x32xf32>
    %374 = arith.addf %368, %373 : vector<2x32xf32>
    %c0_253 = arith.constant 0 : index
    %c0_254 = arith.constant 0 : index
    %375 = vector.load %arg14[%c0_253, %c0_254] : memref<1x32xf32, #tpu.memory_space<vmem>>, vector<1x32xf32>
    %376 = vector.broadcast %375 : vector<1x32xf32> to vector<2x32xf32>
    %377 = arith.addf %374, %376 : vector<2x32xf32>
    %cst_255 = arith.constant 0.000000e+00 : f32
    %378 = vector.broadcast %cst_255 : f32 to vector<2x32xf32>
    %379 = arith.maximumf %377, %378 : vector<2x32xf32>
    %c0_256 = arith.constant 0 : index
    %c0_257 = arith.constant 0 : index
    %380 = vector.load %arg15[%c0_256, %c0_257] : memref<32x32xf32, #tpu.memory_space<vmem>>, vector<32x32xf32>
    %cst_258 = arith.constant dense<0.000000e+00> : vector<2x32xf32>
    %381 = tpu.matmul %379, %380, %cst_258 {dimension_numbers = #tpu.dot_dimension_numbers<[1], [0], [0], [1], [0, 0, 1, 1], [], []>} : vector<2x32xf32>, vector<32x32xf32>, vector<2x32xf32> -> vector<2x32xf32>
    %c0_259 = arith.constant 0 : index
    %c0_260 = arith.constant 0 : index
    %382 = vector.load %arg16[%c0_259, %c0_260] : memref<1x32xf32, #tpu.memory_space<vmem>>, vector<1x32xf32>
    %383 = vector.broadcast %382 : vector<1x32xf32> to vector<2x32xf32>
    %384 = arith.addf %381, %383 : vector<2x32xf32>
    %cst_261 = arith.constant 0.000000e+00 : f32
    %385 = vector.broadcast %cst_261 : f32 to vector<2x32xf32>
    %386 = arith.maximumf %384, %385 : vector<2x32xf32>
    %c0_262 = arith.constant 0 : index
    %c0_263 = arith.constant 0 : index
    %387 = vector.load %arg17[%c0_262, %c0_263] : memref<32x1xf32, #tpu.memory_space<vmem>>, vector<32x1xf32>
    %cst_264 = arith.constant dense<0.000000e+00> : vector<2x1xf32>
    %388 = tpu.matmul %386, %387, %cst_264 {dimension_numbers = #tpu.dot_dimension_numbers<[1], [0], [0], [1], [0, 0, 1, 1], [], []>} : vector<2x32xf32>, vector<32x1xf32>, vector<2x1xf32> -> vector<2x1xf32>
    %c0_265 = arith.constant 0 : index
    %c0_266 = arith.constant 0 : index
    %389 = vector.load %arg18[%c0_265, %c0_266] : memref<1x1xf32, #tpu.memory_space<vmem>>, vector<1x1xf32>
    %390 = vector.broadcast %389 : vector<1x1xf32> to vector<2x1xf32>
    %391 = arith.addf %388, %390 : vector<2x1xf32>
    %392 = arith.negf %391 : vector<2x1xf32>
    %393 = math.exp %392 : vector<2x1xf32>
    %cst_267 = arith.constant 1.000000e+00 : f32
    %394 = vector.broadcast %cst_267 : f32 to vector<2x1xf32>
    %395 = arith.addf %394, %393 : vector<2x1xf32>
    %396 = arith.divf %394, %395 : vector<2x1xf32>
    %c0_268 = arith.constant 0 : index
    %c0_269 = arith.constant 0 : index
    %397 = vector.load %arg19[%c0_268, %c0_269] : memref<2x1xf32, #tpu.memory_space<vmem>>, vector<2x1xf32>
    tpu.vector_store %arg19[%c0_268, %c0_269], %396 {strides = array<i32>} : memref<2x1xf32, #tpu.memory_space<vmem>>, vector<2x1xf32>,
    return
  }
  func.func @transform_0(%arg0: i32) -> (i32, i32, i32) {
    %c0_i32 = arith.constant 0 : i32
    %c0_i32_0 = arith.constant 0 : i32
    %c0_i32_1 = arith.constant 0 : i32
    return %arg0, %c0_i32, %c0_i32_0 : i32, i32, i32
  }
  func.func @transform_1(%arg0: i32) -> (i32, i32) {
    %c0_i32 = arith.constant 0 : i32
    %c0_i32_0 = arith.constant 0 : i32
    return %arg0, %c0_i32 : i32, i32
  }
  func.func @transform_2(%arg0: i32) -> (i32, i32, i32) {
    %c0_i32 = arith.constant 0 : i32
    %c0_i32_0 = arith.constant 0 : i32
    %c0_i32_1 = arith.constant 0 : i32
    %c0_i32_2 = arith.constant 0 : i32
    return %c0_i32, %c0_i32_0, %c0_i32_1 : i32, i32, i32
  }
  func.func @transform_3(%arg0: i32) -> (i32, i32) {
    %c0_i32 = arith.constant 0 : i32
    %c0_i32_0 = arith.constant 0 : i32
    %c0_i32_1 = arith.constant 0 : i32
    return %c0_i32, %c0_i32_0 : i32, i32
  }
  func.func @transform_4(%arg0: i32) -> (i32, i32, i32) {
    %c0_i32 = arith.constant 0 : i32
    %c0_i32_0 = arith.constant 0 : i32
    %c0_i32_1 = arith.constant 0 : i32
    %c0_i32_2 = arith.constant 0 : i32
    return %c0_i32, %c0_i32_0, %c0_i32_1 : i32, i32, i32
  }
  func.func @transform_5(%arg0: i32) -> (i32, i32, i32) {
    %c0_i32 = arith.constant 0 : i32
    %c0_i32_0 = arith.constant 0 : i32
    %c0_i32_1 = arith.constant 0 : i32
    %c0_i32_2 = arith.constant 0 : i32
    return %c0_i32, %c0_i32_0, %c0_i32_1 : i32, i32, i32
  }
  func.func @transform_6(%arg0: i32) -> (i32, i32) {
    %c0_i32 = arith.constant 0 : i32
    %c0_i32_0 = arith.constant 0 : i32
    %c0_i32_1 = arith.constant 0 : i32
    return %c0_i32, %c0_i32_0 : i32, i32
  }
  func.func @transform_7(%arg0: i32) -> (i32, i32, i32) {
    %c0_i32 = arith.constant 0 : i32
    %c0_i32_0 = arith.constant 0 : i32
    %c0_i32_1 = arith.constant 0 : i32
    %c0_i32_2 = arith.constant 0 : i32
    return %c0_i32, %c0_i32_0, %c0_i32_1 : i32, i32, i32
  }
  func.func @transform_8(%arg0: i32) -> (i32, i32, i32) {
    %c0_i32 = arith.constant 0 : i32
    %c0_i32_0 = arith.constant 0 : i32
    %c0_i32_1 = arith.constant 0 : i32
    %c0_i32_2 = arith.constant 0 : i32
    return %c0_i32, %c0_i32_0, %c0_i32_1 : i32, i32, i32
  }
  func.func @transform_9(%arg0: i32) -> (i32, i32) {
    %c0_i32 = arith.constant 0 : i32
    %c0_i32_0 = arith.constant 0 : i32
    %c0_i32_1 = arith.constant 0 : i32
    return %c0_i32, %c0_i32_0 : i32, i32
  }
  func.func @transform_10(%arg0: i32) -> (i32, i32, i32) {
    %c0_i32 = arith.constant 0 : i32
    %c0_i32_0 = arith.constant 0 : i32
    %c0_i32_1 = arith.constant 0 : i32
    %c0_i32_2 = arith.constant 0 : i32
    return %c0_i32, %c0_i32_0, %c0_i32_1 : i32, i32, i32
  }
  func.func @transform_11(%arg0: i32) -> (i32, i32, i32) {
    %c0_i32 = arith.constant 0 : i32
    %c0_i32_0 = arith.constant 0 : i32
    %c0_i32_1 = arith.constant 0 : i32
    %c0_i32_2 = arith.constant 0 : i32
    return %c0_i32, %c0_i32_0, %c0_i32_1 : i32, i32, i32
  }
  func.func @transform_12(%arg0: i32) -> (i32, i32) {
    %c0_i32 = arith.constant 0 : i32
    %c0_i32_0 = arith.constant 0 : i32
    %c0_i32_1 = arith.constant 0 : i32
    return %c0_i32, %c0_i32_0 : i32, i32
  }
  func.func @transform_13(%arg0: i32) -> (i32, i32) {
    %c0_i32 = arith.constant 0 : i32
    %c0_i32_0 = arith.constant 0 : i32
    %c0_i32_1 = arith.constant 0 : i32
    return %c0_i32, %c0_i32_0 : i32, i32
  }
  func.func @transform_14(%arg0: i32) -> (i32, i32) {
    %c0_i32 = arith.constant 0 : i32
    %c0_i32_0 = arith.constant 0 : i32
    %c0_i32_1 = arith.constant 0 : i32
    return %c0_i32, %c0_i32_0 : i32, i32
  }
  func.func @transform_15(%arg0: i32) -> (i32, i32) {
    %c0_i32 = arith.constant 0 : i32
    %c0_i32_0 = arith.constant 0 : i32
    %c0_i32_1 = arith.constant 0 : i32
    return %c0_i32, %c0_i32_0 : i32, i32
  }
  func.func @transform_16(%arg0: i32) -> (i32, i32) {
    %c0_i32 = arith.constant 0 : i32
    %c0_i32_0 = arith.constant 0 : i32
    %c0_i32_1 = arith.constant 0 : i32
    return %c0_i32, %c0_i32_0 : i32, i32
  }
  func.func @transform_17(%arg0: i32) -> (i32, i32) {
    %c0_i32 = arith.constant 0 : i32
    %c0_i32_0 = arith.constant 0 : i32
    %c0_i32_1 = arith.constant 0 : i32
    return %c0_i32, %c0_i32_0 : i32, i32
  }
  func.func @transform_18(%arg0: i32) -> (i32, i32) {
    %c0_i32 = arith.constant 0 : i32
    %c0_i32_0 = arith.constant 0 : i32
    return %arg0, %c0_i32 : i32, i32
  }
}

</mosaic_0001>

<bundles_post_ra>
// kernel: tpu_custom_call.1
= control target key start
LH: loop header
LB: loop body
LE: loop exit
PB: predicated region body
PF: predicated region fallthrough
CT: control target
= control target key end

     0   :  { %vm61_vm0 = vcmask 289792   ;;  %v6057_v1 = vmov 0.0   ;;  %s6058_s30 = smov 2   ;;  %vm111_vm1 = vcmask 31744   ;;  %vm84_vm2 = vcmask 273424   ;;  %s6060_s22 = smov 126   ;;  %s6926_s0 = inlined_call_operand.vmem [shape: f32[2,4,32], index: 0, kind: input, shape index: {}]   ;;  %s6927_s2 = inlined_call_operand.vmem [shape: f32[5,16,4], index: 2, kind: input, shape index: {}]   ;;  %s6928_s3 = inlined_call_operand.vmem [shape: f32[16,1], index: 3, kind: input, shape index: {}]   ;;  %s6929_s4 = inlined_call_operand.vmem [shape: f32[2,32,16], index: 4, kind: input, shape index: {}]   ;;  %s6930_s5 = inlined_call_operand.vmem [shape: f32[5,16,16], index: 5, kind: input, shape index: {}]   ;;  %s6931_s6 = inlined_call_operand.vmem [shape: f32[16,1], index: 6, kind: input, shape index: {}]   ;;  %s6932_s7 = inlined_call_operand.vmem [shape: f32[2,16,8], index: 7, kind: input, shape index: {}]   ;;  %s6933_s8 = inlined_call_operand.vmem [shape: f32[5,16,16], index: 8, kind: input, shape index: {}]   ;;  %s6934_s9 = inlined_call_operand.vmem [shape: f32[16,1], index: 9, kind: input, shape index: {}]   ;;  %s6935_s10 = inlined_call_operand.vmem [shape: f32[2,8,4], index: 10, kind: input, shape index: {}]   ;;  %s6936_s12 = inlined_call_operand.vmem [shape: f32[8,32], index: 12, kind: input, shape index: {}]   ;;  %s6937_s1 = inlined_call_operand.vmem [shape: f32[2,8], index: 1, kind: input, shape index: {}]   ;;  %s6938_s11 = inlined_call_operand.vmem [shape: f32[16,4,32], index: 11, kind: input, shape index: {}]   ;;  %s6939_s14 = inlined_call_operand.vmem [shape: f32[32,32], index: 14, kind: input, shape index: {}]   ;;  %s6940_s16 = inlined_call_operand.vmem [shape: f32[32,1], index: 16, kind: input, shape index: {}]   ;;  %s6941_s13 = inlined_call_operand.vmem [shape: f32[1,32], index: 13, kind: input, shape index: {}]   ;;  %s6942_s17 = inlined_call_operand.<no memory space> [shape: f32[1,1], index: 17, kind: input, shape index: {}]   ;;  %s6943_s15 = inlined_call_operand.vmem [shape: f32[1,32], index: 15, kind: input, shape index: {}]   ;;  %s6944_s18 = inlined_call_operand.vmem [shape: f32[2,1], index: 18, kind: output, shape index: {}]  }
   0x1   :  { %6948 = sst [smem:[#allocation7_spill]] %s6926_s0  ;;  %62 = vst.msk [vmem:[#allocation2] sm:$0xf] %vm61_vm0, %v6057_v1  ;;  %63 = vst.msk [vmem:[#allocation2 + $0x4] sm:$0xf] %vm61_vm0, %v6057_v1  ;;  %vm118_vm3 = vcmask 1043456  }
   0x2   :  { %6949 = sst [smem:[#allocation8_spill]] %s6927_s2  ;;  %v6059_v5 = vmov 0   ;;  %s6062_s27 = smov 125   ;;  %v6250_v21 = vld [vmem:[%s6929_s4 + $0x38] sm:$0xff]  ;;  %v6269_v24 = vld [vmem:[%s6929_s4 + $0x30] sm:$0xff]  ;;  %v6277_v25 = vld [vmem:[%s6929_s4 + $0x28] sm:$0xff] }
   0x3   :  { %6950 = sst [smem:[#allocation9_spill]] %s6928_s3  ;;  %6052 = vset.pattern.permute.xlu1 %v6059_v5  ;;  %6051 = vset.pattern.permute.xlu0 %v6059_v5  ;;  %s6061_s3 = smov 127   ;;  %v6285_v26 = vld [vmem:[%s6929_s4 + $0x20] sm:$0xff]  ;;  %v6298_v28 = vld [vmem:[%s6929_s4 + $0x18] sm:$0xff]  ;;  %v6305_v29 = vld [vmem:[%s6929_s4 + $0x10] sm:$0xff]  ;;  %vm554_vm4 = vcmask 261120  }
   0x4   :  { %s6951_s29 = sld [smem:[#allocation7_spill]]  ;;  %s6063_s28 = smov 124   ;;  %v6312_v30 = vld [vmem:[%s6929_s4 + $0x8] sm:$0xff]  ;;  %v6318_v31 = vld [vmem:[%s6929_s4] sm:$0xff]  ;;  %vm64_vm5 = vcmask 162816   ;;  %vm721_vm6 = vcmask 146448  }
   0x5   :  { %s6952_s2 = sld [smem:[#allocation8_spill]]  ;;  %66 = vst.msk [vmem:[#allocation3 + $0x8] sm:$0xff] %vm64_vm5, %v6057_v1  ;;  %65 = vst.msk [vmem:[#allocation3] sm:$0xff] %vm64_vm5, %v6057_v1  ;;  %vm1325_vm7 = vcmask 130048   ;;  %vm69_vm8 = vcmask 97280   ;;  %vm1935_vm9 = vcmask 80912  }
   0x6   :  { %s6953_s23 = sld [smem:[#allocation9_spill]]  ;;  %67 = vst.msk [vmem:[#allocation3 + $0x10] sm:$0xff] %vm64_vm5, %v6057_v1  ;;  %68 = vst.msk [vmem:[#allocation3 + $0x18] sm:$0xff] %vm64_vm5, %v6057_v1  ;;  %vm2987_vm10 = vcmask 64512   ;;  %vm6064_vm11 = vmmov 0   ;;  %vm3745_vm12 = vcmask 1041409  }
   0x7   :  { %71 = vst.msk [vmem:[#allocation4 + $0x8] sm:$0xff] %vm69_vm8, %v6057_v1  ;;  %70 = vst.msk [vmem:[#allocation4] sm:$0xff] %vm69_vm8, %v6057_v1  ;;  %vm5309_vm13 = vcmask 1024  }
   0x8   :  { %72 = vst.msk [vmem:[#allocation4 + $0x10] sm:$0xff] %vm69_vm8, %v6057_v1  ;;  %73 = vst.msk [vmem:[#allocation4 + $0x18] sm:$0xff] %vm69_vm8, %v6057_v1 }
   0xa   :  { %v74_v0 = vld [vmem:[%s6951_s29] sm:$0xf]  ;;  %v75_v9 = vld [vmem:[%s6951_s29 + $0x4] sm:$0xf] }
   0xb   :  { %78 = vrot.lane.b32.xlu0 %v74_v0, %s6058_s30  ;;  %v6169_v2 = vld [vmem:[%s6952_s2 + $0x10] sm:$0xff]  ;;  %v6174_v3 = vld [vmem:[%s6952_s2] sm:$0xff]  ;;  %v6186_v7 = vld [vmem:[%s6952_s2 + $0x8] sm:$0xff] }
   0xc   :  { %5656 = vmatprep.mubr.msk.f32.mxu0 %vm111_vm1, %v6169_v2  ;;  %5661 = vmatprep.mubr.msk.f32.mxu1 %vm111_vm1, %v6174_v3  ;;  %v6193_v8 = vld [vmem:[%s6952_s2 + $0x30] sm:$0xff]  ;;  %v97_v10 = vld [vmem:[%s6953_s23] sm:$0xff]  ;;  %v98_v11 = vld [vmem:[%s6953_s23 + $0x8] sm:$0xff] }
   0xd   :  { %v6214_v14 = vld [vmem:[%s6952_s2 + $0x18] sm:$0xff]  ;;  %v6220_v15 = vld [vmem:[%s6952_s2 + $0x20] sm:$0xff]  ;;  %v6232_v18 = vld [vmem:[%s6952_s2 + $0x28] sm:$0xff] }
   0xe   :  { %v6237_v19 = vld [vmem:[%s6952_s2 + $0x38] sm:$0xff]  ;;  %v6244_v20 = vld [vmem:[%s6952_s2 + $0x40] sm:$0xff]  ;;  %v6262_v22 = vld [vmem:[%s6952_s2 + $0x48] sm:$0xff] }
  0x7d   :  { %v79_v4 = vpop.permute.xlu0 %78 }
  0x7e   :  { %85 = vst.msk [vmem:[#allocation2] sm:$0xf] %vm84_vm2, %v79_v4 }
  0x85   :  { %v107_v6 = vld [vmem:[#allocation2] sm:$0xf] }
  0x86   :  { %279 = vrot.lane.b32.xlu1 %v107_v6, %s6060_s22  ;;  %109 = vrot.lane.b32.xlu0 %v107_v6, %s6061_s3 }
  0x87   :  { %5659 = vmatprep.subr.msk.mxu1 %vm118_vm3, %v107_v6 }
  0x88   :  { %5660 = vmatpush3.msk.msra.mxu1 %vm118_vm3, %v107_v6 }
  0x89   :  { %5662 = vmatmul.mubr.msk.f32.vlgmr.msra.gmra.mxu1 %vm111_vm1, %v6186_v7 }
  0x8a   :  { %366 = vrot.lane.b32.xlu1 %v107_v6, %s6062_s27  ;;  %453 = vrot.lane.b32.xlu0 %v107_v6, %s6063_s28 }
  0x8b   :  { %5671 = vmatprep.mubr.msk.f32.mxu1 %vm111_vm1, %v6193_v8 }
  0x8e   :  { %80 = vrot.lane.b32.xlu1 %v75_v9, %s6058_s30  ;;  %542 = vperm.xlu0 %6051, %v97_v10  }
  0x92   :  { %547 = vperm.xlu1 %6052, %v98_v11  }
  0xf8   :  { %v280_v12 = vpop.permute.xlu1 %279  ;;  %v110_v13 = vpop.permute.xlu0 %109 }
  0xf9   :  { %5654 = vmatprep.subr.msk.mxu0 %vm118_vm3, %v110_v13 }
  0xfa   :  { %5655 = vmatpush3.msk.msra.mxu0 %vm118_vm3, %v110_v13 }
  0xfb   :  { %5657 = vmatmul.mubr.msk.f32.vlgmr.msra.gmra.mxu0 %vm111_vm1, %v6214_v14  ;;  %5664 = vmatprep.subr.msk.mxu0 %vm118_vm3, %v280_v12 }
  0xfc   :  { %v367_v16 = vpop.permute.xlu1 %366  ;;  %5665 = vmatpush3.msk.msra.mxu0 %vm118_vm3, %v280_v12  ;;  %v454_v17 = vpop.permute.xlu0 %453  ;;  %5666 = vmatprep.mubr.msk.f32.mxu0 %vm111_vm1, %v6220_v15 }
  0xfd   :  { %5669 = vmatprep.subr.msk.mxu1 %vm118_vm3, %v367_v16  ;;  %5674 = vmatprep.subr.msk.mxu0 %vm118_vm3, %v454_v17 }
  0xfe   :  { %5670 = vmatpush3.msk.msra.mxu1 %vm118_vm3, %v367_v16 }
  0xff   :  { %5667 = vmatmul.mubr.msk.f32.vlgmr.msra.gmra.mxu0 %vm111_vm1, %v6232_v18  ;;  %5672 = vmatmul.mubr.msk.f32.vlgmr.msra.gmra.mxu1 %vm111_vm1, %v6237_v19 }
 0x100   :  { %5675 = vmatpush3.msk.msra.mxu0 %vm118_vm3, %v454_v17  ;;  %5676 = vmatprep.mubr.msk.f32.mxu0 %vm111_vm1, %v6244_v20  ;;  %v81_v23 = vpop.permute.xlu1 %80 }
 0x101   :  { %86 = vst.msk [vmem:[#allocation2 + $0x4] sm:$0xf] %vm84_vm2, %v81_v23  ;;  %5690 = vmatprep.subr.mxu0 %v6250_v21  ;;  %5679 = vmatprep.subr.mxu1 %v6298_v28 }
 0x102   :  { %5680 = vmatpush3.msra.mxu1 %v6298_v28 }
 0x103   :  { %5677 = vmatmul.mubr.msk.f32.vlgmr.msra.gmra.mxu0 %vm111_vm1, %v6262_v22  ;;  %5681 = vmatprep.subr.mxu1 %v6305_v29 }
 0x104   :  { %5691 = vmatpush3.msra.mxu0 %v6250_v21  ;;  %5682 = vmatpush3.msra.mxu1 %v6305_v29 }
 0x105   :  { %5692 = vmatprep.subr.mxu0 %v6269_v24  ;;  %5683 = vmatprep.subr.mxu1 %v6312_v30 }
 0x106   :  { %5693 = vmatpush3.msra.mxu0 %v6269_v24  ;;  %5684 = vmatpush3.msra.mxu1 %v6312_v30 }
 0x107   :  { %5694 = vmatprep.subr.mxu0 %v6277_v25  ;;  %5685 = vmatprep.subr.mxu1 %v6318_v31 }
 0x108   :  { %v725_v27 = vld [vmem:[#allocation2 + $0x4] sm:$0xf]  ;;  %5695 = vmatpush3.msra.mxu0 %v6277_v25  ;;  %5686 = vmatpush3.msra.mxu1 %v6318_v31 }
 0x109   :  { %727 = vrot.lane.b32.xlu1 %v725_v27, %s6061_s3  ;;  %883 = vrot.lane.b32.xlu0 %v725_v27, %s6060_s22  ;;  %v6326_v50 = vpop.permute.xlu0 %542 }
 0x10a   :  { %5696 = vmatprep.subr.mxu0 %v6285_v26 }
 0x10b   :  { %5697 = vmatpush3.msra.mxu0 %v6285_v26 }
 0x10c   :  { %5706 = vmatprep.subr.msk.mxu0 %vm118_vm3, %v725_v27 }
 0x10d   :  { %964 = vrot.lane.b32.xlu1 %v725_v27, %s6062_s27  ;;  %1045 = vrot.lane.b32.xlu0 %v725_v27, %s6063_s28  ;;  %v6323_v32 = vpop.permute.xlu1 %547 }
 0x149   :  { %v5663_v34 = vpop.f32.mrf.mxu1 }
 0x14b   :  { %v270_v36 = vpop.f32.mrf.mxu1 }
 0x17b   :  { %v728_v33 = vpop.permute.xlu1 %727  ;;  %v884_v57 = vpop.permute.xlu0 %883 }
 0x17c   :  { %5701 = vmatprep.subr.msk.mxu1 %vm118_vm3, %v728_v33 }
 0x17f   :  { %v965_v58 = vpop.permute.xlu1 %964  ;;  %v1046_v59 = vpop.permute.xlu0 %1045 }
 0x1bb   :  { %v5658_v35 = vpop.f32.mrf.mxu0 }
 0x1bc   :  { %v276_v38 = vadd.f32 %v5663_v34, %v5658_v35 }
 0x1bd   :  { %v187_v37 = vpop.f32.mrf.mxu0 }
 0x1be   :  { %v271_v41 = vadd.f32 %v270_v36, %v187_v37 }
 0x1bf   :  { %v5668_v39 = vpop.f32.mrf.mxu0  ;;  %v5673_v40 = vpop.f32.mrf.mxu1 }
 0x1c0   :  { %v365_v42 = vadd.f32 %v5668_v39, %v276_v38  ;;  %v1309_v39 = vld [vmem:[%s6931_s6] sm:$0xff] }
 0x1c1   :  { %v355_v43 = vpop.f32.mrf.mxu0  ;;  %v442_v46 = vpop.f32.mrf.mxu1 }
 0x1c2   :  { %v452_v44 = vadd.f32 %v5673_v40, %v365_v42  ;;  %v364_v45 = vadd.f32 %v355_v43, %v271_v41  ;;  %v1310_v40 = vld [vmem:[%s6931_s6 + $0x8] sm:$0xff]  ;;  %v6439_v43 = vld [vmem:[%s6930_s5 + $0x18] sm:$0xff] }
 0x1c3   :  { %v5678_v47 = vpop.f32.mrf.mxu0 }
 0x1c4   :  { %v451_v48 = vadd.f32 %v442_v46, %v364_v45  ;;  %v539_v49 = vadd.f32 %v5678_v47, %v452_v44  ;;  %v6444_v44 = vld [vmem:[%s6930_s5 + $0x20] sm:$0xff]  ;;  %v6453_v47 = vld [vmem:[%s6930_s5 + $0x28] sm:$0xff] }
 0x1c5   :  { %v529_v51 = vpop.f32.mrf.mxu0 }
 0x1c6   :  { %v538_v52 = vadd.f32 %v529_v51, %v451_v48  ;;  %v551_v53 = vadd.f32 %v6323_v32, %v539_v49  ;;  %v6458_v48 = vld [vmem:[%s6930_s5 + $0x40] sm:$0xff]  ;;  %v6465_v51 = vld [vmem:[%s6930_s5 + $0x38] sm:$0xff] }
 0x1c8   :  { %v550_v54 = vadd.f32 %v6326_v50, %v538_v52  ;;  %v553_v56 = vmax.f32 %v551_v53, 0.0 }
 0x1ca   :  { %v552_v55 = vmax.f32 %v550_v54, 0.0  ;;  %v6474_v54 = vld [vmem:[%s6930_s5 + $0x48] sm:$0xff] }
 0x1cc   :  { %5687 = vmatprep.mubr.msk.f32.mxu1 %vm554_vm4, %v552_v55  ;;  %5698 = vmatprep.mubr.msk.f32.mxu0 %vm554_vm4, %v552_v55  ;;  %v6479_v55 = vld [vmem:[%s6932_s7 + $0x18] sm:$0xff] }
 0x1cd   :  { %5688 = vmatmul.mubr.msk.f32.vlgmr.msra.gmra.mxu1 %vm554_vm4, %v553_v56  ;;  %5699 = vmatmul.mubr.msk.f32.vlgmr.msra.gmra.mxu0 %vm554_vm4, %v553_v56  ;;  %v6484_v56 = vld [vmem:[%s6932_s7 + $0x10] sm:$0xff] }
 0x1ce   :  { %5702 = vmatpush3.msk.msra.mxu1 %vm118_vm3, %v728_v33  ;;  %5707 = vmatpush3.msk.msra.mxu0 %vm118_vm3, %v725_v27  ;;  %v6400_v27 = vld [vmem:[%s6930_s5] sm:$0xff] }
 0x1cf   :  { %5711 = vmatprep.subr.msk.mxu1 %vm118_vm3, %v884_v57  ;;  %5716 = vmatprep.subr.msk.mxu0 %vm118_vm3, %v965_v58 }
 0x1d0   :  { %5703 = vmatprep.mubr.msk.f32.mxu1 %vm111_vm1, %v6169_v2  ;;  %5708 = vmatprep.mubr.msk.f32.mxu0 %vm111_vm1, %v6174_v3 }
 0x1d1   :  { %5704 = vmatmul.mubr.msk.f32.vlgmr.msra.gmra.mxu1 %vm111_vm1, %v6214_v14  ;;  %5709 = vmatmul.mubr.msk.f32.vlgmr.msra.gmra.mxu0 %vm111_vm1, %v6186_v7 }
 0x1d2   :  { %5712 = vmatpush3.msk.msra.mxu1 %vm118_vm3, %v884_v57  ;;  %5717 = vmatpush3.msk.msra.mxu0 %vm118_vm3, %v965_v58  ;;  %v6495_v57 = vld [vmem:[%s6932_s7 + $0x8] sm:$0xff]  ;;  %v6502_v58 = vld [vmem:[%s6932_s7] sm:$0xff] }
 0x1d3   :  { %5721 = vmatprep.subr.msk.mxu1 %vm118_vm3, %v1046_v59  ;;  %5713 = vmatprep.mubr.msk.f32.mxu1 %vm111_vm1, %v6220_v15 }
 0x1d4   :  { %5718 = vmatprep.mubr.msk.f32.mxu0 %vm111_vm1, %v6193_v8  ;;  %5726 = vmatprep.subr.mxu0 %v6298_v28 }
 0x1d5   :  { %5714 = vmatmul.mubr.msk.f32.vlgmr.msra.gmra.mxu1 %vm111_vm1, %v6232_v18  ;;  %5719 = vmatmul.mubr.msk.f32.vlgmr.msra.gmra.mxu0 %vm111_vm1, %v6237_v19 }
 0x1d6   :  { %5722 = vmatpush3.msk.msra.mxu1 %vm118_vm3, %v1046_v59  ;;  %5723 = vmatprep.mubr.msk.f32.mxu1 %vm111_vm1, %v6244_v20 }
 0x1d7   :  { %5737 = vmatprep.subr.mxu1 %v6250_v21  ;;  %5727 = vmatpush3.msra.mxu0 %v6298_v28 }
 0x1d8   :  { %5728 = vmatprep.subr.mxu0 %v6305_v29 }
 0x1d9   :  { %5724 = vmatmul.mubr.msk.f32.vlgmr.msra.gmra.mxu1 %vm111_vm1, %v6262_v22  ;;  %5729 = vmatpush3.msra.mxu0 %v6305_v29 }
 0x1da   :  { %5738 = vmatpush3.msra.mxu1 %v6250_v21  ;;  %5730 = vmatprep.subr.mxu0 %v6312_v30 }
 0x1db   :  { %5739 = vmatprep.subr.mxu1 %v6269_v24  ;;  %5731 = vmatpush3.msra.mxu0 %v6312_v30 }
 0x1dc   :  { %5740 = vmatpush3.msra.mxu1 %v6269_v24  ;;  %5732 = vmatprep.subr.mxu0 %v6318_v31 }
 0x1dd   :  { %5741 = vmatprep.subr.mxu1 %v6277_v25  ;;  %5733 = vmatpush3.msra.mxu0 %v6318_v31  ;;  %v6410_v31 = vld [vmem:[%s6930_s5 + $0x8] sm:$0xff] }
 0x1de   :  { %5742 = vmatpush3.msra.mxu1 %v6277_v25  ;;  %v6393_v25 = vld [vmem:[%s6930_s5 + $0x10] sm:$0xff] }
 0x1df   :  { %5743 = vmatprep.subr.mxu1 %v6285_v26 }
 0x1e0   :  { %5744 = vmatpush3.msra.mxu1 %v6285_v26 }
 0x28d   :  { %v5689_v60 = vpop.f32.mrf.mxu1  ;;  %v5700_v61 = vpop.f32.mrf.mxu0 }
 0x28e   :  { %v712_v62 = vmax.f32 %v5689_v60, %v5700_v61 }
 0x28f   :  { %v627_v63 = vpop.f32.mrf.mxu1  ;;  %v702_v0 = vpop.f32.mrf.mxu0 }
 0x290   :  { %v711_v2 = vmax.f32 %v627_v63, %v702_v0  ;;  %717 = vrot.lane.b32.xlu1 %v712_v62, %s6058_s30 }
 0x291   :  { %v5705_v3 = vpop.f32.mrf.mxu1  ;;  %v5710_v4 = vpop.f32.mrf.mxu0 }
 0x292   :  { %715 = vrot.lane.b32.xlu0 %v711_v2, %s6058_s30  ;;  %v880_v7 = vadd.f32 %v5710_v4, %v5705_v3 }
 0x293   :  { %v797_v5 = vpop.f32.mrf.mxu1  ;;  %v874_v6 = vpop.f32.mrf.mxu0 }
 0x294   :  { %v875_v10 = vadd.f32 %v874_v6, %v797_v5 }
 0x295   :  { %v5715_v8 = vpop.f32.mrf.mxu1  ;;  %v5720_v9 = vpop.f32.mrf.mxu0 }
 0x296   :  { %v963_v11 = vadd.f32 %v5715_v8, %v880_v7 }
 0x297   :  { %v953_v12 = vpop.f32.mrf.mxu1  ;;  %v1034_v15 = vpop.f32.mrf.mxu0 }
 0x298   :  { %v1044_v13 = vadd.f32 %v5720_v9, %v963_v11  ;;  %v962_v14 = vadd.f32 %v953_v12, %v875_v10 }
 0x299   :  { %v5725_v16 = vpop.f32.mrf.mxu1 }
 0x29a   :  { %v1043_v17 = vadd.f32 %v1034_v15, %v962_v14  ;;  %v1125_v18 = vadd.f32 %v5725_v16, %v1044_v13 }
 0x29b   :  { %v1115_v19 = vpop.f32.mrf.mxu1 }
 0x29c   :  { %v1124_v20 = vadd.f32 %v1115_v19, %v1043_v17  ;;  %v1127_v21 = vadd.f32 %v1125_v18, %v6323_v32  ;;  %v6416_v32 = vld [vmem:[%s6930_s5 + $0x30] sm:$0xff] }
 0x29e   :  { %v1126_v22 = vadd.f32 %v1124_v20, %v6326_v50  ;;  %v1129_v24 = vmax.f32 %v1127_v21, 0.0 }
 0x2a0   :  { %v1128_v23 = vmax.f32 %v1126_v22, 0.0 }
 0x2a2   :  { %5734 = vmatprep.mubr.msk.f32.mxu0 %vm554_vm4, %v1128_v23  ;;  %5745 = vmatprep.mubr.msk.f32.mxu1 %vm554_vm4, %v1128_v23 }
 0x2a3   :  { %5735 = vmatmul.mubr.msk.f32.vlgmr.msra.gmra.mxu0 %vm554_vm4, %v1129_v24  ;;  %5746 = vmatmul.mubr.msk.f32.vlgmr.msra.gmra.mxu1 %vm554_vm4, %v1129_v24 }
 0x2a4   :  { %5752 = vmatprep.mubr.msk.f32.mxu0 %vm1325_vm7, %v6393_v25  ;;  %5759 = vmatprep.mubr.msk.f32.mxu1 %vm1325_vm7, %v6400_v27 }
 0x302   :  { %v718_v26 = vpop.permute.xlu1 %717 }
 0x303   :  { %723 = vst.msk [vmem:[#allocation3 + $0x8] sm:$0xff] %vm721_vm6, %v718_v26 }
 0x304   :  { %v716_v28 = vpop.permute.xlu0 %715 }
 0x305   :  { %722 = vst.msk [vmem:[#allocation3] sm:$0xff] %vm721_vm6, %v716_v28 }
 0x30a   :  { %v1316_v29 = vld [vmem:[#allocation3 + $0x8] sm:$0xff] }
 0x30b   :  { %1321 = vrot.lane.b32.xlu1 %v1316_v29, %s6061_s3  ;;  %5755 = vmatprep.subr.mxu1 %v1316_v29 }
 0x30c   :  { %5756 = vmatpush3.msra.mxu1 %v1316_v29  ;;  %v1315_v30 = vld [vmem:[#allocation3] sm:$0xff] }
 0x30d   :  { %1319 = vrot.lane.b32.xlu0 %v1315_v30, %s6061_s3  ;;  %5757 = vmatprep.subr.mxu1 %v1315_v30 }
 0x30e   :  { %5758 = vmatpush3.msra.mxu1 %v1315_v30 }
 0x30f   :  { %1490 = vrot.lane.b32.xlu1 %v1316_v29, %s6060_s22  ;;  %5760 = vmatmul.mubr.msk.f32.vlgmr.msra.gmra.mxu1 %vm1325_vm7, %v6410_v31 }
 0x310   :  { %5773 = vmatprep.mubr.msk.f32.mxu1 %vm1325_vm7, %v6416_v32 }
 0x311   :  { %1488 = vrot.lane.b32.xlu0 %v1315_v30, %s6060_s22 }
 0x313   :  { %1579 = vrot.lane.b32.xlu1 %v1316_v29, %s6062_s27 }
 0x315   :  { %1577 = vrot.lane.b32.xlu0 %v1315_v30, %s6062_s27 }
 0x317   :  { %1668 = vrot.lane.b32.xlu1 %v1316_v29, %s6063_s28 }
 0x319   :  { %1666 = vrot.lane.b32.xlu0 %v1315_v30, %s6063_s28 }
 0x363   :  { %v5736_v33 = vpop.f32.mrf.mxu0  ;;  %v5747_v34 = vpop.f32.mrf.mxu1 }
 0x364   :  { %v1287_v35 = vmax.f32 %v5736_v33, %v5747_v34 }
 0x365   :  { %v1202_v36 = vpop.f32.mrf.mxu0  ;;  %v1277_v37 = vpop.f32.mrf.mxu1 }
 0x366   :  { %v1286_v38 = vmax.f32 %v1202_v36, %v1277_v37  ;;  %1292 = vrot.lane.b32.xlu1 %v1287_v35, %s6058_s30 }
 0x368   :  { %1290 = vrot.lane.b32.xlu0 %v1286_v38, %s6058_s30 }
 0x36a   :  { %1757 = vperm.xlu1 %6052, %v1309_v39  }
 0x36c   :  { %1762 = vperm.xlu0 %6051, %v1310_v40  }
 0x37d   :  { %v1322_v41 = vpop.permute.xlu1 %1321 }
 0x37e   :  { %5748 = vmatprep.subr.mxu0 %v1322_v41 }
 0x37f   :  { %5749 = vmatpush3.msra.mxu0 %v1322_v41  ;;  %v1320_v42 = vpop.permute.xlu0 %1319 }
 0x380   :  { %5750 = vmatprep.subr.mxu0 %v1320_v42 }
 0x381   :  { %v1491_v45 = vpop.permute.xlu1 %1490  ;;  %5751 = vmatpush3.msra.mxu0 %v1320_v42 }
 0x382   :  { %5753 = vmatmul.mubr.msk.f32.vlgmr.msra.gmra.mxu0 %vm1325_vm7, %v6439_v43  ;;  %5762 = vmatprep.subr.mxu0 %v1491_v45 }
 0x383   :  { %5763 = vmatpush3.msra.mxu0 %v1491_v45  ;;  %v1489_v46 = vpop.permute.xlu0 %1488  ;;  %5766 = vmatprep.mubr.msk.f32.mxu0 %vm1325_vm7, %v6444_v44 }
 0x384   :  { %5764 = vmatprep.subr.mxu0 %v1489_v46 }
 0x385   :  { %v1580_v49 = vpop.permute.xlu1 %1579  ;;  %5765 = vmatpush3.msra.mxu0 %v1489_v46 }
 0x386   :  { %5767 = vmatmul.mubr.msk.f32.vlgmr.msra.gmra.mxu0 %vm1325_vm7, %v6453_v47  ;;  %5769 = vmatprep.subr.mxu1 %v1580_v49 }
 0x387   :  { %v1578_v50 = vpop.permute.xlu0 %1577  ;;  %5770 = vmatpush3.msra.mxu1 %v1580_v49  ;;  %5780 = vmatprep.mubr.msk.f32.mxu0 %vm1325_vm7, %v6458_v48 }
 0x388   :  { %5771 = vmatprep.subr.mxu1 %v1578_v50 }
 0x389   :  { %v1669_v52 = vpop.permute.xlu1 %1668  ;;  %5772 = vmatpush3.msra.mxu1 %v1578_v50 }
 0x38a   :  { %5774 = vmatmul.mubr.msk.f32.vlgmr.msra.gmra.mxu1 %vm1325_vm7, %v6465_v51  ;;  %5776 = vmatprep.subr.mxu0 %v1669_v52 }
 0x38b   :  { %5777 = vmatpush3.msra.mxu0 %v1669_v52  ;;  %v1667_v53 = vpop.permute.xlu0 %1666  ;;  %5783 = vmatprep.subr.mxu1 %v6495_v57 }
 0x38c   :  { %5778 = vmatprep.subr.mxu0 %v1667_v53  ;;  %5784 = vmatpush3.msra.mxu1 %v6495_v57 }
 0x38d   :  { %5779 = vmatpush3.msra.mxu0 %v1667_v53  ;;  %5785 = vmatprep.subr.mxu1 %v6502_v58 }
 0x38e   :  { %5781 = vmatmul.mubr.msk.f32.vlgmr.msra.gmra.mxu0 %vm1325_vm7, %v6474_v54  ;;  %5790 = vmatprep.subr.mxu0 %v6479_v55 }
 0x38f   :  { %5791 = vmatpush3.msra.mxu0 %v6479_v55  ;;  %5786 = vmatpush3.msra.mxu1 %v6502_v58 }
 0x390   :  { %5792 = vmatprep.subr.mxu0 %v6484_v56 }
 0x391   :  { %5793 = vmatpush3.msra.mxu0 %v6484_v56 }
 0x3cf   :  { %v5761_v0 = vpop.f32.mrf.mxu1 }
 0x3d1   :  { %v1479_v4 = vpop.f32.mrf.mxu1 }
 0x3d8   :  { %v1293_v59 = vpop.permute.xlu1 %1292 }
 0x3d9   :  { %1298 = vst.msk [vmem:[#allocation3 + $0x18] sm:$0xff] %vm721_vm6, %v1293_v59 }
 0x3da   :  { %v1291_v60 = vpop.permute.xlu0 %1290 }
 0x3db   :  { %1297 = vst.msk [vmem:[#allocation3 + $0x10] sm:$0xff] %vm721_vm6, %v1291_v60 }
 0x3e0   :  { %v1939_v61 = vld [vmem:[#allocation3 + $0x18] sm:$0xff] }
 0x3e1   :  { %1944 = vrot.lane.b32.xlu1 %v1939_v61, %s6061_s3  ;;  %5804 = vmatprep.subr.mxu0 %v1939_v61 }
 0x3e2   :  { %v1938_v62 = vld [vmem:[#allocation3 + $0x10] sm:$0xff] }
 0x3e3   :  { %1942 = vrot.lane.b32.xlu0 %v1938_v62, %s6061_s3 }
 0x3e5   :  { %2100 = vrot.lane.b32.xlu1 %v1939_v61, %s6060_s22  ;;  %v6516_v14 = vpop.permute.xlu1 %1757 }
 0x3e7   :  { %2098 = vrot.lane.b32.xlu0 %v1938_v62, %s6060_s22  ;;  %v6518_v18 = vpop.permute.xlu0 %1762 }
 0x3e9   :  { %2183 = vrot.lane.b32.xlu1 %v1939_v61, %s6062_s27 }
 0x3eb   :  { %2181 = vrot.lane.b32.xlu0 %v1938_v62, %s6062_s27 }
 0x3ed   :  { %2266 = vrot.lane.b32.xlu1 %v1939_v61, %s6063_s28 }
 0x3ef   :  { %2264 = vrot.lane.b32.xlu0 %v1938_v62, %s6063_s28 }
 0x442   :  { %v5754_v63 = vpop.f32.mrf.mxu0 }
 0x443   :  { %v1485_v3 = vadd.f32 %v5761_v0, %v5754_v63 }
 0x444   :  { %v1398_v2 = vpop.f32.mrf.mxu0 }
 0x445   :  { %v1480_v6 = vadd.f32 %v1479_v4, %v1398_v2  ;;  %v6592_v4 = vld [vmem:[%s6933_s8 + $0x30] sm:$0xff] }
 0x446   :  { %v5768_v5 = vpop.f32.mrf.mxu0 }
 0x447   :  { %v1576_v7 = vadd.f32 %v5768_v5, %v1485_v3  ;;  %v6586_v3 = vld [vmem:[%s6933_s8 + $0x8] sm:$0xff] }
 0x448   :  { %v1566_v8 = vpop.f32.mrf.mxu0 }
 0x449   :  { %v1575_v11 = vadd.f32 %v1566_v8, %v1480_v6 }
 0x44a   :  { %v5775_v9 = vpop.f32.mrf.mxu1 }
 0x44b   :  { %v1665_v12 = vadd.f32 %v5775_v9, %v1576_v7 }
 0x44c   :  { %v1655_v10 = vpop.f32.mrf.mxu1 }
 0x44d   :  { %v1664_v15 = vadd.f32 %v1655_v10, %v1575_v11  ;;  %v2530_v11 = vld [vmem:[%s6934_s9] sm:$0xff] }
 0x44e   :  { %v5782_v13 = vpop.f32.mrf.mxu0 }
 0x44f   :  { %v1754_v16 = vadd.f32 %v5782_v13, %v1665_v12  ;;  %v2531_v12 = vld [vmem:[%s6934_s9 + $0x8] sm:$0xff] }
 0x450   :  { %v1744_v17 = vpop.f32.mrf.mxu0 }
 0x451   :  { %v1753_v19 = vadd.f32 %v1744_v17, %v1664_v15  ;;  %v1766_v20 = vadd.f32 %v6518_v18, %v1754_v16  ;;  %v6615_v15 = vld [vmem:[%s6933_s8 + $0x18] sm:$0xff]  ;;  %v6620_v16 = vld [vmem:[%s6933_s8 + $0x20] sm:$0xff] }
 0x453   :  { %v1765_v21 = vadd.f32 %v6516_v14, %v1753_v19  ;;  %v1945_v22 = vpop.permute.xlu1 %1944  ;;  %v1768_v26 = vmax.f32 %v1766_v20, 0.0  ;;  %v6629_v19 = vld [vmem:[%s6933_s8 + $0x28] sm:$0xff]  ;;  %v6634_v20 = vld [vmem:[%s6933_s8 + $0x40] sm:$0xff] }
 0x454   :  { %5797 = vmatprep.subr.mxu1 %v1945_v22 }
 0x455   :  { %v1767_v23 = vmax.f32 %v1765_v21, 0.0  ;;  %v1943_v24 = vpop.permute.xlu0 %1942 }
 0x457   :  { %v2101_v28 = vpop.permute.xlu1 %2100  ;;  %5787 = vmatprep.mubr.msk.f32.mxu1 %vm1325_vm7, %v1767_v23  ;;  %5794 = vmatprep.mubr.msk.f32.mxu0 %vm1325_vm7, %v1767_v23  ;;  %v6641_v23 = vld [vmem:[%s6933_s8 + $0x38] sm:$0xff] }
 0x458   :  { %5788 = vmatmul.mubr.msk.f32.vlgmr.msra.gmra.mxu1 %vm1325_vm7, %v1768_v26  ;;  %5795 = vmatmul.mubr.msk.f32.vlgmr.msra.gmra.mxu0 %vm1325_vm7, %v1768_v26 }
 0x459   :  { %5798 = vmatpush3.msra.mxu1 %v1945_v22  ;;  %5805 = vmatpush3.msra.mxu0 %v1939_v61  ;;  %v2099_v29 = vpop.permute.xlu0 %2098  ;;  %v6569_v61 = vld [vmem:[%s6933_s8 + $0x10] sm:$0xff] }
 0x45a   :  { %5799 = vmatprep.subr.mxu1 %v1943_v24  ;;  %5806 = vmatprep.subr.mxu0 %v1938_v62 }
 0x45b   :  { %5800 = vmatpush3.msra.mxu1 %v1943_v24  ;;  %5807 = vmatpush3.msra.mxu0 %v1938_v62  ;;  %v2184_v30 = vpop.permute.xlu1 %2183  ;;  %v6577_v62 = vld [vmem:[%s6933_s8] sm:$0xff] }
 0x45c   :  { %5801 = vmatprep.mubr.msk.f32.mxu1 %vm1325_vm7, %v6393_v25  ;;  %5808 = vmatprep.mubr.msk.f32.mxu0 %vm1325_vm7, %v6400_v27 }
 0x45d   :  { %5811 = vmatprep.subr.mxu1 %v2101_v28  ;;  %5802 = vmatmul.mubr.msk.f32.vlgmr.msra.gmra.mxu1 %vm1325_vm7, %v6439_v43  ;;  %v2182_v33 = vpop.permute.xlu0 %2181 }
 0x45e   :  { %5809 = vmatmul.mubr.msk.f32.vlgmr.msra.gmra.mxu0 %vm1325_vm7, %v6410_v31  ;;  %5812 = vmatpush3.msra.mxu1 %v2101_v28  ;;  %v6650_v28 = vld [vmem:[%s6933_s8 + $0x48] sm:$0xff] }
 0x45f   :  { %5818 = vmatprep.subr.mxu0 %v2184_v30  ;;  %5813 = vmatprep.subr.mxu1 %v2099_v29  ;;  %v2267_v34 = vpop.permute.xlu1 %2266 }
 0x460   :  { %5819 = vmatpush3.msra.mxu0 %v2184_v30  ;;  %5814 = vmatpush3.msra.mxu1 %v2099_v29  ;;  %v6655_v29 = vld [vmem:[%s6935_s10 + $0x8] sm:$0xff]  ;;  %v6664_v30 = vld [vmem:[%s6935_s10] sm:$0xff] }
 0x461   :  { %5820 = vmatprep.subr.mxu0 %v2182_v33  ;;  %5815 = vmatprep.mubr.msk.f32.mxu1 %vm1325_vm7, %v6444_v44  ;;  %v2265_v25 = vpop.permute.xlu0 %2264 }
 0x462   :  { %5821 = vmatpush3.msra.mxu0 %v2182_v33  ;;  %5822 = vmatprep.mubr.msk.f32.mxu0 %vm1325_vm7, %v6416_v32 }
 0x463   :  { %5816 = vmatmul.mubr.msk.f32.vlgmr.msra.gmra.mxu1 %vm1325_vm7, %v6453_v47  ;;  %5823 = vmatmul.mubr.msk.f32.vlgmr.msra.gmra.mxu0 %vm1325_vm7, %v6465_v51 }
 0x464   :  { %5825 = vmatprep.subr.mxu1 %v2267_v34  ;;  %5829 = vmatprep.mubr.msk.f32.mxu1 %vm1325_vm7, %v6458_v48 }
 0x465   :  { %5826 = vmatpush3.msra.mxu1 %v2267_v34  ;;  %5832 = vmatprep.subr.mxu0 %v6495_v57 }
 0x466   :  { %5827 = vmatprep.subr.mxu1 %v2265_v25  ;;  %5833 = vmatpush3.msra.mxu0 %v6495_v57 }
 0x467   :  { %5828 = vmatpush3.msra.mxu1 %v2265_v25  ;;  %5834 = vmatprep.subr.mxu0 %v6502_v58 }
 0x468   :  { %5830 = vmatmul.mubr.msk.f32.vlgmr.msra.gmra.mxu1 %vm1325_vm7, %v6474_v54  ;;  %5839 = vmatprep.subr.mxu1 %v6479_v55 }
 0x469   :  { %5840 = vmatpush3.msra.mxu1 %v6479_v55  ;;  %5835 = vmatpush3.msra.mxu0 %v6502_v58 }
 0x46a   :  { %5841 = vmatprep.subr.mxu1 %v6484_v56 }
 0x46b   :  { %5842 = vmatpush3.msra.mxu1 %v6484_v56 }
 0x518   :  { %v5789_v27 = vpop.f32.mrf.mxu1  ;;  %v5796_v31 = vpop.f32.mrf.mxu0 }
 0x519   :  { %v1926_v32 = vmax.f32 %v5789_v27, %v5796_v31 }
 0x51a   :  { %v1841_v35 = vpop.f32.mrf.mxu1  ;;  %v1916_v36 = vpop.f32.mrf.mxu0 }
 0x51b   :  { %v1925_v37 = vmax.f32 %v1841_v35, %v1916_v36  ;;  %1931 = vrot.lane.b32.xlu1 %v1926_v32, %s6058_s30 }
 0x51d   :  { %v5803_v38 = vpop.f32.mrf.mxu1  ;;  %1929 = vrot.lane.b32.xlu0 %v1925_v37, %s6058_s30 }
 0x51e   :  { %v5810_v39 = vpop.f32.mrf.mxu0 }
 0x51f   :  { %v2014_v40 = vpop.f32.mrf.mxu1  ;;  %v2095_v42 = vadd.f32 %v5810_v39, %v5803_v38 }
 0x520   :  { %v2089_v41 = vpop.f32.mrf.mxu0 }
 0x521   :  { %v2090_v45 = vadd.f32 %v2089_v41, %v2014_v40 }
 0x523   :  { %v5817_v43 = vpop.f32.mrf.mxu1  ;;  %v5824_v44 = vpop.f32.mrf.mxu0 }
 0x524   :  { %v2180_v46 = vadd.f32 %v5817_v43, %v2095_v42 }
 0x525   :  { %v2170_v47 = vpop.f32.mrf.mxu1  ;;  %v2253_v50 = vpop.f32.mrf.mxu0 }
 0x526   :  { %v2263_v48 = vadd.f32 %v5824_v44, %v2180_v46  ;;  %v2179_v49 = vadd.f32 %v2170_v47, %v2090_v45 }
 0x528   :  { %v2262_v51 = vadd.f32 %v2253_v50, %v2179_v49  ;;  %v5831_v52 = vpop.f32.mrf.mxu1 }
 0x529   :  { %v2346_v53 = vadd.f32 %v5831_v52, %v2263_v48 }
 0x52a   :  { %v2336_v54 = vpop.f32.mrf.mxu1 }
 0x52b   :  { %v2345_v55 = vadd.f32 %v2336_v54, %v2262_v51  ;;  %v2348_v56 = vadd.f32 %v2346_v53, %v6518_v18 }
 0x52d   :  { %v2347_v57 = vadd.f32 %v2345_v55, %v6516_v14  ;;  %v2350_v59 = vmax.f32 %v2348_v56, 0.0 }
 0x52f   :  { %v2349_v58 = vmax.f32 %v2347_v57, 0.0 }
 0x531   :  { %5836 = vmatprep.mubr.msk.f32.mxu0 %vm1325_vm7, %v2349_v58  ;;  %5843 = vmatprep.mubr.msk.f32.mxu1 %vm1325_vm7, %v2349_v58 }
 0x532   :  { %5837 = vmatmul.mubr.msk.f32.vlgmr.msra.gmra.mxu0 %vm1325_vm7, %v2350_v59  ;;  %5844 = vmatmul.mubr.msk.f32.vlgmr.msra.gmra.mxu1 %vm1325_vm7, %v2350_v59 }
 0x533   :  { %5850 = vmatprep.mubr.msk.f32.mxu0 %vm1325_vm7, %v6569_v61  ;;  %5857 = vmatprep.mubr.msk.f32.mxu1 %vm1325_vm7, %v6577_v62 }
 0x58d   :  { %v1932_v60 = vpop.permute.xlu1 %1931 }
 0x58e   :  { %1937 = vst.msk [vmem:[#allocation4 + $0x8] sm:$0xff] %vm1935_vm9, %v1932_v60 }
 0x58f   :  { %v1930_v63 = vpop.permute.xlu0 %1929 }
 0x590   :  { %1936 = vst.msk [vmem:[#allocation4] sm:$0xff] %vm1935_vm9, %v1930_v63 }
 0x595   :  { %v2535_v0 = vld [vmem:[#allocation4 + $0x8] sm:$0xff] }
 0x596   :  { %2540 = vrot.lane.b32.xlu1 %v2535_v0, %s6061_s3  ;;  %5853 = vmatprep.subr.mxu1 %v2535_v0 }
 0x597   :  { %5854 = vmatpush3.msra.mxu1 %v2535_v0  ;;  %v2534_v2 = vld [vmem:[#allocation4] sm:$0xff] }
 0x598   :  { %2538 = vrot.lane.b32.xlu0 %v2534_v2, %s6061_s3  ;;  %5855 = vmatprep.subr.mxu1 %v2534_v2 }
 0x599   :  { %5856 = vmatpush3.msra.mxu1 %v2534_v2 }
 0x59a   :  { %2708 = vrot.lane.b32.xlu1 %v2535_v0, %s6060_s22  ;;  %5858 = vmatmul.mubr.msk.f32.vlgmr.msra.gmra.mxu1 %vm1325_vm7, %v6586_v3 }
 0x59b   :  { %5871 = vmatprep.mubr.msk.f32.mxu1 %vm1325_vm7, %v6592_v4 }
 0x59c   :  { %2706 = vrot.lane.b32.xlu0 %v2534_v2, %s6060_s22 }
 0x59e   :  { %2797 = vrot.lane.b32.xlu1 %v2535_v0, %s6062_s27 }
 0x5a0   :  { %2795 = vrot.lane.b32.xlu0 %v2534_v2, %s6062_s27 }
 0x5a2   :  { %2886 = vrot.lane.b32.xlu1 %v2535_v0, %s6063_s28 }
 0x5a4   :  { %2884 = vrot.lane.b32.xlu0 %v2534_v2, %s6063_s28 }
 0x5f2   :  { %v5838_v5 = vpop.f32.mrf.mxu0  ;;  %v5845_v6 = vpop.f32.mrf.mxu1 }
 0x5f3   :  { %v2508_v7 = vmax.f32 %v5838_v5, %v5845_v6 }
 0x5f4   :  { %v2423_v8 = vpop.f32.mrf.mxu0  ;;  %v2498_v9 = vpop.f32.mrf.mxu1 }
 0x5f5   :  { %v2507_v10 = vmax.f32 %v2423_v8, %v2498_v9  ;;  %2513 = vrot.lane.b32.xlu1 %v2508_v7, %s6058_s30 }
 0x5f7   :  { %2511 = vrot.lane.b32.xlu0 %v2507_v10, %s6058_s30 }
 0x5f9   :  { %2975 = vperm.xlu1 %6052, %v2530_v11  }
 0x5fb   :  { %2980 = vperm.xlu0 %6051, %v2531_v12  }
 0x608   :  { %v2541_v13 = vpop.permute.xlu1 %2540 }
 0x609   :  { %5846 = vmatprep.subr.mxu0 %v2541_v13 }
 0x60a   :  { %5847 = vmatpush3.msra.mxu0 %v2541_v13  ;;  %v2539_v14 = vpop.permute.xlu0 %2538 }
 0x60b   :  { %5848 = vmatprep.subr.mxu0 %v2539_v14 }
 0x60c   :  { %v2709_v17 = vpop.permute.xlu1 %2708  ;;  %5849 = vmatpush3.msra.mxu0 %v2539_v14 }
 0x60d   :  { %5860 = vmatprep.subr.mxu0 %v2709_v17  ;;  %5851 = vmatmul.mubr.msk.f32.vlgmr.msra.gmra.mxu0 %vm1325_vm7, %v6615_v15 }
 0x60e   :  { %5861 = vmatpush3.msra.mxu0 %v2709_v17  ;;  %v2707_v18 = vpop.permute.xlu0 %2706  ;;  %5864 = vmatprep.mubr.msk.f32.mxu0 %vm1325_vm7, %v6620_v16 }
 0x60f   :  { %5862 = vmatprep.subr.mxu0 %v2707_v18 }
 0x610   :  { %v2798_v21 = vpop.permute.xlu1 %2797  ;;  %5863 = vmatpush3.msra.mxu0 %v2707_v18 }
 0x611   :  { %5867 = vmatprep.subr.mxu1 %v2798_v21  ;;  %5865 = vmatmul.mubr.msk.f32.vlgmr.msra.gmra.mxu0 %vm1325_vm7, %v6629_v19 }
 0x612   :  { %v2796_v22 = vpop.permute.xlu0 %2795  ;;  %5868 = vmatpush3.msra.mxu1 %v2798_v21  ;;  %5878 = vmatprep.mubr.msk.f32.mxu0 %vm1325_vm7, %v6634_v20 }
 0x613   :  { %5869 = vmatprep.subr.mxu1 %v2796_v22 }
 0x614   :  { %v2887_v24 = vpop.permute.xlu1 %2886  ;;  %5870 = vmatpush3.msra.mxu1 %v2796_v22 }
 0x615   :  { %5872 = vmatmul.mubr.msk.f32.vlgmr.msra.gmra.mxu1 %vm1325_vm7, %v6641_v23  ;;  %5874 = vmatprep.subr.mxu0 %v2887_v24 }
 0x616   :  { %5875 = vmatpush3.msra.mxu0 %v2887_v24  ;;  %v2885_v26 = vpop.permute.xlu0 %2884  ;;  %5881 = vmatprep.subr.mxu1 %v6664_v30 }
 0x617   :  { %5876 = vmatprep.subr.mxu0 %v2885_v26  ;;  %5882 = vmatpush3.msra.mxu1 %v6664_v30 }
 0x618   :  { %5877 = vmatpush3.msra.mxu0 %v2885_v26 }
 0x619   :  { %5879 = vmatmul.mubr.msk.f32.vlgmr.msra.gmra.mxu0 %vm1325_vm7, %v6650_v28  ;;  %5886 = vmatprep.subr.mxu0 %v6655_v29 }
 0x61a   :  { %5887 = vmatpush3.msra.mxu0 %v6655_v29 }
 0x65a   :  { %v5859_v32 = vpop.f32.mrf.mxu1 }
 0x65c   :  { %v2697_v37 = vpop.f32.mrf.mxu1 }
 0x667   :  { %v2514_v33 = vpop.permute.xlu1 %2513 }
 0x668   :  { %2519 = vst.msk [vmem:[#allocation4 + $0x18] sm:$0xff] %vm1935_vm9, %v2514_v33 }
 0x669   :  { %v2512_v34 = vpop.permute.xlu0 %2511 }
 0x66a   :  { %2518 = vst.msk [vmem:[#allocation4 + $0x10] sm:$0xff] %vm1935_vm9, %v2512_v34  ;;  %v3723_v34 = vld [vmem:[%s6936_s12] sm:$0xff] }
 0x66f   :  { %v3149_v25 = vld [vmem:[#allocation4 + $0x18] sm:$0xff] }
 0x670   :  { %3154 = vrot.lane.b32.xlu1 %v3149_v25, %s6061_s3  ;;  %5898 = vmatprep.subr.mxu0 %v3149_v25 }
 0x671   :  { %v3148_v27 = vld [vmem:[#allocation4 + $0x10] sm:$0xff] }
 0x672   :  { %3152 = vrot.lane.b32.xlu0 %v3148_v27, %s6061_s3 }
 0x674   :  { %3310 = vrot.lane.b32.xlu1 %v3149_v25, %s6060_s22  ;;  %v6680_v52 = vpop.permute.xlu1 %2975 }
 0x676   :  { %3308 = vrot.lane.b32.xlu0 %v3148_v27, %s6060_s22  ;;  %v6678_v50 = vpop.permute.xlu0 %2980 }
 0x678   :  { %3393 = vrot.lane.b32.xlu1 %v3149_v25, %s6062_s27 }
 0x67a   :  { %3391 = vrot.lane.b32.xlu0 %v3148_v27, %s6062_s27 }
 0x67c   :  { %3476 = vrot.lane.b32.xlu1 %v3149_v25, %s6063_s28 }
 0x67e   :  { %3474 = vrot.lane.b32.xlu0 %v3148_v27, %s6063_s28 }
 0x6cd   :  { %v5852_v31 = vpop.f32.mrf.mxu0 }
 0x6ce   :  { %v2703_v36 = vadd.f32 %v5859_v32, %v5852_v31  ;;  %v3726_v31 = vld [vmem:[%s6938_s11 + $0x8] sm:$0xf] }
 0x6cf   :  { %v2616_v35 = vpop.f32.mrf.mxu0 }
 0x6d0   :  { %v2698_v39 = vadd.f32 %v2697_v37, %v2616_v35 }
 0x6d1   :  { %v5866_v38 = vpop.f32.mrf.mxu0 }
 0x6d2   :  { %v2794_v40 = vadd.f32 %v5866_v38, %v2703_v36 }
 0x6d3   :  { %v2784_v41 = vpop.f32.mrf.mxu0 }
 0x6d4   :  { %v2793_v44 = vadd.f32 %v2784_v41, %v2698_v39 }
 0x6d5   :  { %v5873_v42 = vpop.f32.mrf.mxu1 }
 0x6d6   :  { %v2883_v45 = vadd.f32 %v5873_v42, %v2794_v40 }
 0x6d7   :  { %v2873_v43 = vpop.f32.mrf.mxu1 }
 0x6d8   :  { %v2882_v47 = vadd.f32 %v2873_v43, %v2793_v44 }
 0x6d9   :  { %v5880_v46 = vpop.f32.mrf.mxu0 }
 0x6da   :  { %v2972_v48 = vadd.f32 %v5880_v46, %v2883_v45 }
 0x6db   :  { %v2962_v49 = vpop.f32.mrf.mxu0 }
 0x6dc   :  { %v2971_v51 = vadd.f32 %v2962_v49, %v2882_v47  ;;  %v2984_v53 = vadd.f32 %v6678_v50, %v2972_v48  ;;  %v3725_v48 = vld [vmem:[%s6938_s11 + $0x4] sm:$0xf] }
 0x6de   :  { %v2983_v54 = vadd.f32 %v6680_v52, %v2971_v51  ;;  %v2986_v56 = vmax.f32 %v2984_v53, 0.0  ;;  %v3728_v51 = vld [vmem:[%s6938_s11 + $0x10] sm:$0xf] }
 0x6e0   :  { %v2985_v55 = vmax.f32 %v2983_v54, 0.0 }
 0x6e2   :  { %v3155_v57 = vpop.permute.xlu1 %3154  ;;  %5883 = vmatprep.mubr.msk.f32.mxu1 %vm2987_vm10, %v2985_v55  ;;  %5888 = vmatprep.mubr.msk.f32.mxu0 %vm2987_vm10, %v2985_v55 }
 0x6e3   :  { %5891 = vmatprep.subr.mxu1 %v3155_v57  ;;  %5884 = vmatmul.mubr.msk.f32.vlgmr.msra.gmra.mxu1 %vm2987_vm10, %v2986_v56 }
 0x6e4   :  { %v3153_v58 = vpop.permute.xlu0 %3152  ;;  %5889 = vmatmul.mubr.msk.f32.vlgmr.msra.gmra.mxu0 %vm2987_vm10, %v2986_v56  ;;  %5892 = vmatpush3.msra.mxu1 %v3155_v57 }
 0x6e5   :  { %5899 = vmatpush3.msra.mxu0 %v3149_v25  ;;  %5893 = vmatprep.subr.mxu1 %v3153_v58  ;;  %v3722_v25 = vld [vmem:[%s6937_s1] sm:$0x3] }
 0x6e6   :  { %v3311_v59 = vpop.permute.xlu1 %3310  ;;  %5900 = vmatprep.subr.mxu0 %v3148_v27  ;;  %5894 = vmatpush3.msra.mxu1 %v3153_v58  ;;  %v3727_v58 = vld [vmem:[%s6938_s11 + $0xc] sm:$0xf] }
 0x6e7   :  { %5901 = vmatpush3.msra.mxu0 %v3148_v27  ;;  %5895 = vmatprep.mubr.msk.f32.mxu1 %vm1325_vm7, %v6569_v61  ;;  %v3724_v27 = vld [vmem:[%s6938_s11] sm:$0xf] }
 0x6e8   :  { %v3309_v60 = vpop.permute.xlu0 %3308  ;;  %5902 = vmatprep.mubr.msk.f32.mxu0 %vm1325_vm7, %v6577_v62  ;;  %5905 = vmatprep.subr.mxu1 %v3311_v59 }
 0x6e9   :  { %5896 = vmatmul.mubr.msk.f32.vlgmr.msra.gmra.mxu1 %vm1325_vm7, %v6615_v15  ;;  %5903 = vmatmul.mubr.msk.f32.vlgmr.msra.gmra.mxu0 %vm1325_vm7, %v6586_v3 }
 0x6ea   :  { %v3394_v63 = vpop.permute.xlu1 %3393  ;;  %5906 = vmatpush3.msra.mxu1 %v3311_v59  ;;  %5909 = vmatprep.mubr.msk.f32.mxu1 %vm1325_vm7, %v6620_v16 }
 0x6eb   :  { %5912 = vmatprep.subr.mxu0 %v3394_v63  ;;  %5907 = vmatprep.subr.mxu1 %v3309_v60 }
 0x6ec   :  { %v3392_v0 = vpop.permute.xlu0 %3391  ;;  %5913 = vmatpush3.msra.mxu0 %v3394_v63  ;;  %5908 = vmatpush3.msra.mxu1 %v3309_v60  ;;  %v3730_v63 = vld [vmem:[%s6938_s11 + $0x18] sm:$0xf] }
 0x6ed   :  { %5914 = vmatprep.subr.mxu0 %v3392_v0  ;;  %5910 = vmatmul.mubr.msk.f32.vlgmr.msra.gmra.mxu1 %vm1325_vm7, %v6629_v19 }
 0x6ee   :  { %v3477_v61 = vpop.permute.xlu1 %3476  ;;  %5915 = vmatpush3.msra.mxu0 %v3392_v0  ;;  %5916 = vmatprep.mubr.msk.f32.mxu0 %vm1325_vm7, %v6592_v4 }
 0x6ef   :  { %5919 = vmatprep.subr.mxu1 %v3477_v61  ;;  %5917 = vmatmul.mubr.msk.f32.vlgmr.msra.gmra.mxu0 %vm1325_vm7, %v6641_v23 }
 0x6f0   :  { %v3475_v62 = vpop.permute.xlu0 %3474  ;;  %5920 = vmatpush3.msra.mxu1 %v3477_v61  ;;  %5923 = vmatprep.mubr.msk.f32.mxu1 %vm1325_vm7, %v6634_v20 }
 0x6f1   :  { %5921 = vmatprep.subr.mxu1 %v3475_v62  ;;  %5926 = vmatprep.subr.mxu0 %v6664_v30 }
 0x6f2   :  { %5922 = vmatpush3.msra.mxu1 %v3475_v62  ;;  %5927 = vmatpush3.msra.mxu0 %v6664_v30 }
 0x6f3   :  { %5924 = vmatmul.mubr.msk.f32.vlgmr.msra.gmra.mxu1 %vm1325_vm7, %v6650_v28  ;;  %5931 = vmatprep.subr.mxu1 %v6655_v29 }
 0x6f4   :  { %5932 = vmatpush3.msra.mxu1 %v6655_v29  ;;  %5936 = vmatprep.subr.mxu0 %v6057_v1 }
 0x6f5   :  { %5941 = vmatprep.subr.mxu1 %v6057_v1 }
 0x7a3   :  { %v5885_v2 = vpop.f32.mrf.mxu1 }
 0x7a4   :  { %v5890_v3 = vpop.f32.mrf.mxu0 }
 0x7a5   :  { %v3145_v4 = vmax.f32 %v5885_v2, %v5890_v3  ;;  %v3060_v5 = vpop.f32.mrf.mxu1 }
 0x7a6   :  { %v3135_v6 = vpop.f32.mrf.mxu0 }
 0x7a7   :  { %3147 = vst.msk [vmem:[#allocation5 + $0x8] sm:$0xff] %vm111_vm1, %v3145_v4  ;;  %v3144_v7 = vmax.f32 %v3060_v5, %v3135_v6  ;;  %v3729_v5 = vld [vmem:[%s6938_s11 + $0x14] sm:$0xf] }
 0x7a9   :  { %3146 = vst.msk [vmem:[#allocation5] sm:$0xff] %vm111_vm1, %v3144_v7  ;;  %v5897_v8 = vpop.f32.mrf.mxu1  ;;  %v5904_v9 = vpop.f32.mrf.mxu0 }
 0x7aa   :  { %v3305_v12 = vadd.f32 %v5904_v9, %v5897_v8  ;;  %v3732_v8 = vld [vmem:[%s6938_s11 + $0x20] sm:$0xf] }
 0x7ab   :  { %v3224_v10 = vpop.f32.mrf.mxu1  ;;  %v3299_v11 = vpop.f32.mrf.mxu0 }
 0x7ac   :  { %v3300_v14 = vadd.f32 %v3299_v11, %v3224_v10 }
 0x7ad   :  { %v5911_v13 = vpop.f32.mrf.mxu1 }
 0x7ae   :  { %v3390_v15 = vadd.f32 %v5911_v13, %v3305_v12 }
 0x7af   :  { %v5918_v16 = vpop.f32.mrf.mxu0  ;;  %v3380_v17 = vpop.f32.mrf.mxu1 }
 0x7b0   :  { %v3473_v18 = vadd.f32 %v5918_v16, %v3390_v15  ;;  %v3389_v19 = vadd.f32 %v3380_v17, %v3300_v14  ;;  %v3740_v43 = vld [vmem:[#allocation5] sm:$0x1]  ;;  %v3977_v47 = vld [vmem:[#allocation5 + $0x2] sm:$0x1]  ;;  %v3895_v56 = vld [vmem:[#allocation5 + $0x1] sm:$0x1] }
 0x7b1   :  { %v3463_v20 = vpop.f32.mrf.mxu0  ;;  %v4141_v57 = vld [vmem:[#allocation5 + $0x4] sm:$0x1]  ;;  %v4059_v3 = vld [vmem:[#allocation5 + $0x3] sm:$0x1]  ;;  %v4305_v4 = vld [vmem:[#allocation5 + $0x6] sm:$0x1] }
 0x7b2   :  { %v3472_v21 = vadd.f32 %v3463_v20, %v3389_v19  ;;  %v4223_v13 = vld [vmem:[#allocation5 + $0x5] sm:$0x1]  ;;  %v4469_v14 = vld [vmem:[#allocation5 + $0x8] sm:$0x1]  ;;  %v3731_v15 = vld [vmem:[%s6938_s11 + $0x1c] sm:$0xf] }
 0x7b3   :  { %v5925_v22 = vpop.f32.mrf.mxu1 }
 0x7b4   :  { %v3556_v23 = vadd.f32 %v5925_v22, %v3473_v18  ;;  %v3734_v18 = vld [vmem:[%s6938_s11 + $0x28] sm:$0xf] }
 0x7b5   :  { %v3546_v24 = vpop.f32.mrf.mxu1 }
 0x7b6   :  { %v3555_v26 = vadd.f32 %v3546_v24, %v3472_v21  ;;  %v3558_v28 = vadd.f32 %v3556_v23, %v6678_v50  ;;  %v4387_v23 = vld [vmem:[#allocation5 + $0x7] sm:$0x1]  ;;  %v4633_v24 = vld [vmem:[#allocation5 + $0xa] sm:$0x1] }
 0x7b8   :  { %v3557_v29 = vadd.f32 %v3555_v26, %v6680_v52  ;;  %v3560_v33 = vmax.f32 %v3558_v28, 0.0  ;;  %v3733_v26 = vld [vmem:[%s6938_s11 + $0x24] sm:$0xf] }
 0x7ba   :  { %v3559_v30 = vmax.f32 %v3557_v29, 0.0 }
 0x7bc   :  { %5928 = vmatprep.mubr.msk.f32.mxu0 %vm2987_vm10, %v3559_v30  ;;  %5933 = vmatprep.mubr.msk.f32.mxu1 %vm2987_vm10, %v3559_v30  ;;  %v3736_v30 = vld [vmem:[%s6938_s11 + $0x30] sm:$0xf] }
 0x7bd   :  { %5929 = vmatmul.mubr.msk.f32.vlgmr.msra.gmra.mxu0 %vm2987_vm10, %v3560_v33  ;;  %5934 = vmatmul.mubr.msk.f32.vlgmr.msra.gmra.mxu1 %vm2987_vm10, %v3560_v33 }
 0x7be   :  { %5943 = vmatprep.mubr.msk.f32.mxu1 %vm6064_vm11, %v6057_v1  ;;  %5938 = vmatprep.mubr.msk.f32.mxu0 %vm6064_vm11, %v6057_v1 }
 0x7bf   :  { %5942 = vmatpush3.msra.mxu1 %v3723_v34  ;;  %5937 = vmatpush3.msk.msra.mxu0 %vm118_vm3, %v3724_v27 }
 0x7c0   :  { %5951 = vmatprep.subr.mxu1 %v6057_v1  ;;  %5946 = vmatprep.subr.mxu0 %v6057_v1 }
 0x7c1   :  { %5944 = vmatmul.mubr.msk.f32.vlgmr.msra.gmra.mxu1 %vm2987_vm10, %v3722_v25 }
 0x7c2   :  { %5952 = vmatpush3.msk.msra.mxu1 %vm118_vm3, %v3726_v31  ;;  %5953 = vmatprep.mubr.msk.f32.mxu1 %vm6064_vm11, %v6057_v1  ;;  %v4551_v31 = vld [vmem:[#allocation5 + $0x9] sm:$0x1] }
 0x7c3   :  { %5961 = vmatprep.subr.mxu1 %v6057_v1 }
 0x87d   :  { %v5930_v32 = vpop.f32.mrf.mxu0  ;;  %v5935_v35 = vpop.f32.mrf.mxu1 }
 0x87e   :  { %v3718_v36 = vmax.f32 %v5930_v32, %v5935_v35  ;;  %v4797_v32 = vld [vmem:[#allocation5 + $0xc] sm:$0x1]  ;;  %v3735_v35 = vld [vmem:[%s6938_s11 + $0x2c] sm:$0xf] }
 0x87f   :  { %v3633_v37 = vpop.f32.mrf.mxu0  ;;  %v3708_v38 = vpop.f32.mrf.mxu1 }
 0x880   :  { %3721 = vst.msk [vmem:[#allocation5 + $0x18] sm:$0xff] %vm111_vm1, %v3718_v36  ;;  %v3717_v39 = vmax.f32 %v3633_v37, %v3708_v38  ;;  %v3738_v38 = vld [vmem:[%s6938_s11 + $0x38] sm:$0xf] }
 0x882   :  { %3720 = vst.msk [vmem:[#allocation5 + $0x10] sm:$0xff] %vm111_vm1, %v3717_v39 }
 0x887   :  { %v4470_v2 = vld [vmem:[#allocation5 + $0x18] sm:$0x1]  ;;  %v4634_v12 = vld [vmem:[#allocation5 + $0x1a] sm:$0x1]  ;;  %v4552_v21 = vld [vmem:[#allocation5 + $0x19] sm:$0x1] }
 0x888   :  { %v4473_v10 = vrot.slane %v4470_v2, 7  ;;  %v4637_v20 = vrot.slane %v4634_v12, 7  ;;  %v4798_v22 = vld [vmem:[#allocation5 + $0x1c] sm:$0x1]  ;;  %v4555_v33 = vrot.slane %v4552_v21, 7 }
 0x889   :  { %v3741_v40 = vld [vmem:[#allocation5 + $0x10] sm:$0x1]  ;;  %v3978_v41 = vld [vmem:[#allocation5 + $0x12] sm:$0x1]  ;;  %v3896_v42 = vld [vmem:[#allocation5 + $0x11] sm:$0x1] }
 0x88a   :  { %v3744_v44 = vrot.slane %v3741_v40, 7  ;;  %v3981_v45 = vrot.slane %v3978_v41, 7  ;;  %v4142_v46 = vld [vmem:[#allocation5 + $0x14] sm:$0x1]  ;;  %v3899_v52 = vrot.slane %v3896_v42, 7  ;;  %v4474_v17 = vsel %vm3745_vm12, %v4473_v10, %v4469_v14 }
 0x88b   :  { %v4145_v53 = vrot.slane %v4142_v46, 7  ;;  %v4060_v54 = vld [vmem:[#allocation5 + $0x13] sm:$0x1]  ;;  %v4306_v55 = vld [vmem:[#allocation5 + $0x16] sm:$0x1]  ;;  %v4638_v29 = vsel %vm3745_vm12, %v4637_v20, %v4633_v24  ;;  %v4801_v34 = vrot.slane %v4798_v22, 7  ;;  %v4556_v36 = vsel %vm3745_vm12, %v4555_v33, %v4551_v31 }
 0x88c   :  { %v3746_v49 = vsel %vm3745_vm12, %v3744_v44, %v3740_v43  ;;  %v3982_v50 = vsel %vm3745_vm12, %v3981_v45, %v3977_v47  ;;  %v3900_v59 = vsel %vm3745_vm12, %v3899_v52, %v3895_v56  ;;  %v4063_v0 = vrot.slane %v4060_v54, 7  ;;  %v4224_v62 = vld [vmem:[#allocation5 + $0x15] sm:$0x1]  ;;  %v4388_v11 = vld [vmem:[#allocation5 + $0x17] sm:$0x1] }
 0x88d   :  { %5939 = vmatmul.mubr.msk.f32.vlgmr.msra.gmra.mxu0 %vm111_vm1, %v3746_v49  ;;  %5954 = vmatmul.mubr.msk.f32.vlgmr.msra.gmra.mxu1 %vm111_vm1, %v3982_v50  ;;  %v4146_v60 = vsel %vm3745_vm12, %v4145_v53, %v4141_v57  ;;  %v4309_v61 = vrot.slane %v4306_v55, 7  ;;  %v4227_v9 = vrot.slane %v4224_v62, 7  ;;  %v4391_v19 = vrot.slane %v4388_v11, 7  ;;  %v4716_v25 = vld [vmem:[#allocation5 + $0x1b] sm:$0x1]  ;;  %v3891_v55 = vpop.f32.mrf.mxu1  ;;  %v5137_v57 = vld [vmem:[%s6939_s14 + $0x18] sm:$0xff] }
 0x88e   :  { %5947 = vmatpush3.msk.msra.mxu0 %vm118_vm3, %v3725_v48  ;;  %5948 = vmatprep.mubr.msk.f32.mxu0 %vm6064_vm11, %v6057_v1  ;;  %v4064_v6 = vsel %vm3745_vm12, %v4063_v0, %v4059_v3  ;;  %v4962_v27 = vld [vmem:[#allocation5 + $0x1e] sm:$0x1]  ;;  %v4802_v37 = vsel %vm3745_vm12, %v4801_v34, %v4797_v32  ;;  %v4719_v39 = vrot.slane %v4716_v25, 7  ;;  %v4880_v41 = vld [vmem:[#allocation5 + $0x1d] sm:$0x1] }
 0x88f   :  { %5962 = vmatpush3.msk.msra.mxu1 %vm118_vm3, %v3728_v51  ;;  %5963 = vmatprep.mubr.msk.f32.mxu1 %vm6064_vm11, %v6057_v1  ;;  %v4310_v7 = vsel %vm3745_vm12, %v4309_v61, %v4305_v4  ;;  %v4228_v16 = vsel %vm3745_vm12, %v4227_v9, %v4223_v13  ;;  %v4392_v28 = vsel %vm3745_vm12, %v4391_v19, %v4387_v23  ;;  %v4965_v40 = vrot.slane %v4962_v27, 7  ;;  %v4715_v42 = vld [vmem:[#allocation5 + $0xb] sm:$0x1]  ;;  %v4961_v43 = vld [vmem:[#allocation5 + $0xe] sm:$0x1]  ;;  %v5945_v56 = vpop.f32.mrf.mxu1 }
 0x890   :  { %5956 = vmatprep.subr.mxu0 %v6057_v1  ;;  %5971 = vmatprep.subr.mxu1 %v6057_v1  ;;  %v3737_v44 = vld [vmem:[%s6938_s11 + $0x34] sm:$0xf]  ;;  %v4720_v45 = vsel %vm3745_vm12, %v4719_v39, %v4715_v42  ;;  %v4883_v47 = vrot.slane %v4880_v41, 7  ;;  %v5044_v48 = vld [vmem:[#allocation5 + $0x1f] sm:$0x1] }
 0x891   :  { %5949 = vmatmul.mubr.msk.f32.vlgmr.msra.gmra.mxu0 %vm111_vm1, %v3900_v59  ;;  %5964 = vmatmul.mubr.msk.f32.vlgmr.msra.gmra.mxu1 %vm111_vm1, %v4146_v60  ;;  %v4966_v46 = vsel %vm3745_vm12, %v4965_v40, %v4961_v43  ;;  %v4879_v49 = vld [vmem:[#allocation5 + $0xd] sm:$0x1]  ;;  %v3739_v50 = vld [vmem:[%s6938_s11 + $0x3c] sm:$0xf]  ;;  %v5047_v52 = vrot.slane %v5044_v48, 7  ;;  %v5135_v59 = vld [vmem:[%s6939_s14 + $0x8] sm:$0xff] }
 0x892   :  { %5957 = vmatpush3.msk.msra.mxu0 %vm118_vm3, %v3727_v58  ;;  %5958 = vmatprep.mubr.msk.f32.mxu0 %vm6064_vm11, %v6057_v1  ;;  %v4884_v51 = vsel %vm3745_vm12, %v4883_v47, %v4879_v49  ;;  %v5043_v53 = vld [vmem:[#allocation5 + $0xf] sm:$0x1]  ;;  %v5222_v60 = vld [vmem:[%s6940_s16 + $0x18] sm:$0xff] }
 0x893   :  { %5972 = vmatpush3.msk.msra.mxu1 %vm118_vm3, %v3730_v63  ;;  %5973 = vmatprep.mubr.msk.f32.mxu1 %vm6064_vm11, %v6057_v1  ;;  %v5048_v54 = vsel %vm3745_vm12, %v5047_v52, %v5043_v53  ;;  %v5136_v58 = vld [vmem:[%s6939_s14 + $0x10] sm:$0xff]  ;;  %v5134_v63 = vld [vmem:[%s6939_s14] sm:$0xff]  ;;  %v23_v53 = vstv %s6942_s17 }
 0x894   :  { %5966 = vmatprep.subr.mxu0 %v6057_v1  ;;  %5981 = vmatprep.subr.mxu1 %v6057_v1  ;;  %v5219_v52 = vld [vmem:[%s6940_s16] sm:$0xff]  ;;  %24 = vst [vmem:[#allocation6] sm:$0x1] %v23_v53 }
 0x895   :  { %5959 = vmatmul.mubr.msk.f32.vlgmr.msra.gmra.mxu0 %vm111_vm1, %v4064_v6  ;;  %5974 = vmatmul.mubr.msk.f32.vlgmr.msra.gmra.mxu1 %vm111_vm1, %v4310_v7 }
 0x896   :  { %5967 = vmatpush3.msk.msra.mxu0 %vm118_vm3, %v3729_v5  ;;  %5968 = vmatprep.mubr.msk.f32.mxu0 %vm6064_vm11, %v6057_v1 }
 0x897   :  { %5982 = vmatpush3.msk.msra.mxu1 %vm118_vm3, %v3732_v8  ;;  %5983 = vmatprep.mubr.msk.f32.mxu1 %vm6064_vm11, %v6057_v1 }
 0x898   :  { %5976 = vmatprep.subr.mxu0 %v6057_v1  ;;  %5991 = vmatprep.subr.mxu1 %v6057_v1 }
 0x899   :  { %5969 = vmatmul.mubr.msk.f32.vlgmr.msra.gmra.mxu0 %vm111_vm1, %v4228_v16  ;;  %5984 = vmatmul.mubr.msk.f32.vlgmr.msra.gmra.mxu1 %vm111_vm1, %v4474_v17 }
 0x89a   :  { %5977 = vmatpush3.msk.msra.mxu0 %vm118_vm3, %v3731_v15  ;;  %5978 = vmatprep.mubr.msk.f32.mxu0 %vm6064_vm11, %v6057_v1 }
 0x89b   :  { %5992 = vmatpush3.msk.msra.mxu1 %vm118_vm3, %v3734_v18  ;;  %5993 = vmatprep.mubr.msk.f32.mxu1 %vm6064_vm11, %v6057_v1 }
 0x89c   :  { %5986 = vmatprep.subr.mxu0 %v6057_v1  ;;  %6001 = vmatprep.subr.mxu1 %v6057_v1 }
 0x89d   :  { %5979 = vmatmul.mubr.msk.f32.vlgmr.msra.gmra.mxu0 %vm111_vm1, %v4392_v28  ;;  %5994 = vmatmul.mubr.msk.f32.vlgmr.msra.gmra.mxu1 %vm111_vm1, %v4638_v29 }
 0x89e   :  { %5987 = vmatpush3.msk.msra.mxu0 %vm118_vm3, %v3733_v26  ;;  %5988 = vmatprep.mubr.msk.f32.mxu0 %vm6064_vm11, %v6057_v1 }
 0x89f   :  { %6002 = vmatpush3.msk.msra.mxu1 %vm118_vm3, %v3736_v30  ;;  %6003 = vmatprep.mubr.msk.f32.mxu1 %vm6064_vm11, %v6057_v1 }
 0x8a0   :  { %5996 = vmatprep.subr.mxu0 %v6057_v1  ;;  %6011 = vmatprep.subr.mxu1 %v6057_v1 }
 0x8a1   :  { %5989 = vmatmul.mubr.msk.f32.vlgmr.msra.gmra.mxu0 %vm111_vm1, %v4556_v36  ;;  %6004 = vmatmul.mubr.msk.f32.vlgmr.msra.gmra.mxu1 %vm111_vm1, %v4802_v37 }
 0x8a2   :  { %5997 = vmatpush3.msk.msra.mxu0 %vm118_vm3, %v3735_v35  ;;  %5998 = vmatprep.mubr.msk.f32.mxu0 %vm6064_vm11, %v6057_v1 }
 0x8a3   :  { %6012 = vmatpush3.msk.msra.mxu1 %vm118_vm3, %v3738_v38  ;;  %6013 = vmatprep.mubr.msk.f32.mxu1 %vm6064_vm11, %v6057_v1 }
 0x8a4   :  { %6006 = vmatprep.subr.mxu0 %v6057_v1  ;;  %6021 = vmatprep.subr.mxu1 %v6057_v1 }
 0x8a5   :  { %5999 = vmatmul.mubr.msk.f32.vlgmr.msra.gmra.mxu0 %vm111_vm1, %v4720_v45  ;;  %6014 = vmatmul.mubr.msk.f32.vlgmr.msra.gmra.mxu1 %vm111_vm1, %v4966_v46  ;;  %v5442_v45 = vld [vmem:[%s6941_s13] ss:$0 sm:$0xff] }
 0x8a6   :  { %6007 = vmatpush3.msk.msra.mxu0 %vm118_vm3, %v3737_v44  ;;  %6008 = vmatprep.mubr.msk.f32.mxu0 %vm6064_vm11, %v6057_v1 }
 0x8a7   :  { %6016 = vmatprep.subr.mxu0 %v6057_v1  ;;  %6029 = vmatprep.mubr.msk.f32.mxu1 %vm6064_vm11, %v6057_v1 }
 0x8a8   :  { %6022 = vmatpush3.msra.mxu1 %v5137_v57 }
 0x8a9   :  { %6009 = vmatmul.mubr.msk.f32.vlgmr.msra.gmra.mxu0 %vm111_vm1, %v4884_v51  ;;  %6023 = vmatprep.subr.mxu1 %v6057_v1  ;;  %v5220_v51 = vld [vmem:[%s6940_s16 + $0x8] sm:$0xff] }
 0x8aa   :  { %6017 = vmatpush3.msk.msra.mxu0 %vm118_vm3, %v3739_v50  ;;  %6018 = vmatprep.mubr.msk.f32.mxu0 %vm6064_vm11, %v6057_v1  ;;  %v5221_v50 = vld [vmem:[%s6940_s16 + $0x10] sm:$0xff] }
 0x8ab   :  { %6032 = vmatprep.subr.mxu0 %v6057_v1  ;;  %6024 = vmatpush3.msra.mxu1 %v5136_v58 }
 0x8ac   :  { %6025 = vmatprep.subr.mxu1 %v6057_v1 }
 0x8ad   :  { %6019 = vmatmul.mubr.msk.f32.vlgmr.msra.gmra.mxu0 %vm111_vm1, %v5048_v54  ;;  %6026 = vmatpush3.msra.mxu1 %v5135_v59  ;;  %v5443_v54 = vld [vmem:[%s6943_s15] ss:$0 sm:$0xff]  ;;  %v5445_v59 = vld [vmem:[#allocation6] ss:$0 sm:$0xff] }
 0x8ae   :  { %6040 = vmatprep.mubr.msk.f32.mxu0 %vm6064_vm11, %v6057_v1  ;;  %6033 = vmatpush3.msra.mxu0 %v5222_v60 }
 0x8af   :  { %6034 = vmatprep.subr.mxu0 %v6057_v1  ;;  %6027 = vmatprep.subr.mxu1 %v6057_v1 }
 0x8b0   :  { %6028 = vmatpush3.msra.mxu1 %v5134_v63  ;;  %6035 = vmatpush3.msra.mxu0 %v5221_v50 }
 0x8b1   :  { %6036 = vmatprep.subr.mxu0 %v6057_v1 }
 0x8b2   :  { %6037 = vmatpush3.msra.mxu0 %v5220_v51 }
 0x8b3   :  { %6038 = vmatprep.subr.mxu0 %v6057_v1 }
 0x8b4   :  { %6039 = vmatpush3.msra.mxu0 %v5219_v52 }
 0x94d   :  { %v3818_v0 = vpop.f32.mrf.mxu0  ;;  %v4054_v61 = vpop.f32.mrf.mxu1 }
 0x94e   :  { %v3892_v3 = vadd.f32 %v3891_v55, %v3818_v0 }
 0x94f   :  { %v5940_v62 = vpop.f32.mrf.mxu0  ;;  %v5955_v2 = vpop.f32.mrf.mxu1 }
 0x951   :  { %v3972_v4 = vpop.f32.mrf.mxu0  ;;  %v4218_v5 = vpop.f32.mrf.mxu1 }
 0x952   :  { %v3976_v6 = vadd.f32 %v3972_v4, %v3892_v3 }
 0x953   :  { %v5950_v7 = vpop.f32.mrf.mxu0  ;;  %v5965_v8 = vpop.f32.mrf.mxu1 }
 0x954   :  { %v4058_v9 = vadd.f32 %v4054_v61, %v3976_v6 }
 0x955   :  { %v4136_v10 = vpop.f32.mrf.mxu0  ;;  %v4382_v11 = vpop.f32.mrf.mxu1 }
 0x956   :  { %v4140_v12 = vadd.f32 %v4136_v10, %v4058_v9 }
 0x957   :  { %v5960_v13 = vpop.f32.mrf.mxu0  ;;  %v5975_v14 = vpop.f32.mrf.mxu1 }
 0x958   :  { %v4222_v15 = vadd.f32 %v4218_v5, %v4140_v12 }
 0x959   :  { %v4300_v16 = vpop.f32.mrf.mxu0  ;;  %v4546_v17 = vpop.f32.mrf.mxu1 }
 0x95a   :  { %v4304_v18 = vadd.f32 %v4300_v16, %v4222_v15 }
 0x95b   :  { %v5970_v19 = vpop.f32.mrf.mxu0  ;;  %v5985_v20 = vpop.f32.mrf.mxu1 }
 0x95c   :  { %v4386_v21 = vadd.f32 %v4382_v11, %v4304_v18 }
 0x95d   :  { %v4464_v22 = vpop.f32.mrf.mxu0  ;;  %v4710_v23 = vpop.f32.mrf.mxu1 }
 0x95e   :  { %v4468_v24 = vadd.f32 %v4464_v22, %v4386_v21 }
 0x95f   :  { %v5980_v26 = vpop.f32.mrf.mxu0  ;;  %v5995_v28 = vpop.f32.mrf.mxu1 }
 0x960   :  { %v4550_v29 = vadd.f32 %v4546_v17, %v4468_v24 }
 0x961   :  { %v4628_v30 = vpop.f32.mrf.mxu0  ;;  %v4874_v33 = vpop.f32.mrf.mxu1 }
 0x962   :  { %v4632_v34 = vadd.f32 %v4628_v30, %v4550_v29 }
 0x963   :  { %v5990_v25 = vpop.f32.mrf.mxu0  ;;  %v6005_v27 = vpop.f32.mrf.mxu1 }
 0x964   :  { %v4714_v31 = vadd.f32 %v4710_v23, %v4632_v34 }
 0x965   :  { %v4792_v32 = vpop.f32.mrf.mxu0  ;;  %v5038_v35 = vpop.f32.mrf.mxu1 }
 0x966   :  { %v4796_v36 = vadd.f32 %v4792_v32, %v4714_v31 }
 0x967   :  { %v6000_v37 = vpop.f32.mrf.mxu0  ;;  %v6015_v38 = vpop.f32.mrf.mxu1 }
 0x968   :  { %v4878_v39 = vadd.f32 %v4874_v33, %v4796_v36 }
 0x969   :  { %v4956_v40 = vpop.f32.mrf.mxu0 }
 0x96a   :  { %v4960_v41 = vadd.f32 %v4956_v40, %v4878_v39 }
 0x96b   :  { %v6010_v42 = vpop.f32.mrf.mxu0 }
 0x96c   :  { %v5042_v43 = vadd.f32 %v5038_v35, %v4960_v41 }
 0x96d   :  { %v5120_v44 = vpop.f32.mrf.mxu0 }
 0x96e   :  { %v5124_v46 = vadd.f32 %v5120_v44, %v5042_v43 }
 0x96f   :  { %v6020_v47 = vpop.f32.mrf.mxu0 }
 0x970   :  { %v5132_v48 = vadd.f32 %v5442_v45, %v5124_v46 }
 0x972   :  { %v5133_v49 = vmax.f32 %v5132_v48, 0.0 }
 0x974   :  { %6030 = vmatmul.mubr.msk.f32.vlgmr.msra.gmra.mxu1 %vm554_vm4, %v5133_v49 }
 0xa34   :  { %v5214_v55 = vpop.f32.mrf.mxu1 }
 0xa35   :  { %v5215_v56 = vadd.f32 %v5443_v54, %v5214_v55 }
 0xa36   :  { %v6031_v57 = vpop.f32.mrf.mxu1 }
 0xa37   :  { %v5218_v58 = vmax.f32 %v5215_v56, 0.0 }
 0xa39   :  { %6041 = vmatmul.mubr.msk.f32.vlgmr.msra.gmra.mxu0 %vm554_vm4, %v5218_v58 }
 0xaf9   :  { %v5299_v60 = vpop.f32.mrf.mxu0 }
 0xafa   :  { %v5300_v63 = vadd.f32 %v5445_v59, %v5299_v60 }
 0xafb   :  { %v6042_v0 = vpop.f32.mrf.mxu0 }
 0xafc   :  { %v5447_v61 = vmul.f32 -1.442695, %v5300_v63 }
 0xafe   :  { %6053 = vpow2.f32 %v5447_v61 }
 0xb0b   :  { %v6054_v62 = vpop.eup %6053 }
 0xb0c   :  { %v5306_v1 = vadd.f32 1.0, %v6054_v62 }
 0xb0e   :  { %6055 = vrcp.f32 %v5306_v1 }
 0xb1b   :  { %v6056_v2 = vpop.eup %6055 }
 0xb1c   :  { %5310 = vst.msk [vmem:[%s6944_s18] sm:$0x3] %vm5309_vm13, %v6056_v2 }

</bundles_post_ra>
